<compile_context>
chip_gen: v7x
topology: tpu7x:2x2x1
jax: 0.10.0
libtpu: 0.0.40
codegen_flags: <defaults>
</compile_context>

<pallas_src>
import numpy as np
import jax
import jax.numpy as jnp
from jax.experimental import pallas as pl
from jax.experimental.pallas import tpu as pltpu


def _interp_matrix_np(out_size, in_size):
    """Row-stochastic 1-D bilinear interpolation matrix (align_corners=True)."""
    if out_size == 1:
        src = np.zeros((1,), np.float32)
    else:
        src = np.arange(out_size, dtype=np.float32) * (in_size - 1) / (out_size - 1)
    lo = np.clip(np.floor(src).astype(np.int32), 0, in_size - 1)
    hi = np.clip(lo + 1, 0, in_size - 1)
    frac = src - lo.astype(np.float32)
    cols = np.arange(in_size)
    m_lo = (cols[None, :] == lo[:, None]).astype(np.float32) * (1.0 - frac)[:, None]
    m_hi = (cols[None, :] == hi[:, None]).astype(np.float32) * frac[:, None]
    return m_lo + m_hi


def make_up_params(key, in_chnls, out_chnls, skip_chnls):
    """Synthetic parameters: kernel-ready (bf16 matmul layout, BN-folded) and
    reference-ready (f32 HWIO + scale/shift) copies of the same weights."""
    cat_ch = in_chnls + skip_chnls
    k1, k2, k3, k4 = jax.random.split(key, 4)
    w1 = jax.random.normal(k1, (3, 3, cat_ch, out_chnls), jnp.float32)
    w1 = w1 * (1.0 / jnp.sqrt(9.0 * cat_ch))
    w2 = jax.random.normal(k2, (3, 3, out_chnls, out_chnls), jnp.float32)
    w2 = w2 * (1.0 / jnp.sqrt(9.0 * out_chnls))
    eps = 1e-5
    gamma1 = 1.0 + 0.1 * jax.random.normal(k3, (out_chnls,), jnp.float32)
    beta1 = 0.05 * jnp.arange(out_chnls, dtype=jnp.float32)
    gamma2 = 1.0 + 0.1 * jax.random.normal(k4, (out_chnls,), jnp.float32)
    beta2 = -0.03 * jnp.arange(out_chnls, dtype=jnp.float32)
    # inference-mode BatchNorm fold (running_mean=0, running_var=1)
    scale1 = gamma1 / jnp.sqrt(1.0 + eps)
    scale2 = gamma2 / jnp.sqrt(1.0 + eps)
    # kernel layout: (Cout, 9*Cin), tap index t = 3*kh + kw, BN scale folded in, bf16
    w1_mat = (jnp.transpose(w1, (3, 0, 1, 2)).reshape(out_chnls, 9 * cat_ch)
              * scale1[:, None]).astype(jnp.bfloat16)
    w2_mat = (jnp.transpose(w2, (3, 0, 1, 2)).reshape(out_chnls, 9 * out_chnls)
              * scale2[:, None]).astype(jnp.bfloat16)
    return dict(
        w1_mat=w1_mat, b1=beta1.reshape(out_chnls, 1),
        w2_mat=w2_mat, b2=beta2.reshape(out_chnls, 1),
        # pure-JAX reference copies (f32)
        w1_hwio=w1, w2_hwio=w2,
        scale1=scale1.reshape(1, out_chnls), shift1=beta1.reshape(1, out_chnls),
        scale2=scale2.reshape(1, out_chnls), shift2=beta2.reshape(1, out_chnls),
    )


def up_forward(x, skip, params, mode="bilinear"):
    """NCHW -> NCHW, single fused Pallas kernel per batch element."""
    assert mode == "bilinear"  # TODO(synk): other interpolate modes not implemented
    N, Cin, Hin, Win = x.shape
    Ns, Cskip, Hs, Ws = skip.shape
    assert Ns == N
    Ccat = Cin + Cskip
    C1 = params["w1_mat"].shape[0]
    C2 = params["w2_mat"].shape[0]
    HWin = Hin * Win
    HW = Hs * Ws
    Wp = Ws + 2                                         # padded row width
    SL = Hs * Wp                                        # width of one im2col tap slice
    PADW = ((Hs + 2) * Wp + 2 + 127) // 128 * 128       # padded-image lane width (+2 slack
                                                        # for the last tap slice)

    # ---- tiny constant operators (compile-time numpy; no O(HW^2) matrices) ----
    rh = _interp_matrix_np(Hs, Hin)                     # (Hs, Hin)
    rw = _interp_matrix_np(Ws, Win)                     # (Ws, Win)
    r_mat = np.einsum("hp,wq->pqhw", rh, rw).reshape(HWin, HW)
    # upsample directly into the zero-padded layout: compact (h,w) -> (h+1)*Wp+(w+1)
    cc = np.arange(HW)
    dst = (cc // Ws + 1) * Wp + (cc % Ws + 1)
    r_pad = np.zeros((HWin, PADW), np.float32)
    r_pad[:, dst] = r_mat
    # valid-column mask for the "wide" conv-output layout (kills 2 junk cols per row)
    valid = ((np.arange(SL) % Wp) < Ws).astype(np.float32).reshape(1, SL)

    def kernel(x_ref, skip_ref, r_ref, mask_ref, w1_ref, b1_ref, w2_ref, b2_ref,
               o_ref, pad1_ref, pad2_ref, patch1_ref, patch2_ref):
        f32 = jnp.float32
        bf16 = jnp.bfloat16

        # --- bilinear upsample of x straight into the padded layout (one bf16 matmul;
        #     r_pad's zero columns supply the SAME-padding zeros for these channels) ---
        xu = jnp.dot(x_ref[0], r_ref[...], preferred_element_type=f32)   # (Cin, PADW)
        pad1_ref[0:Cin, :] = xu.astype(bf16)

        # --- channel concat of skip: zero its padded rows once, then Hs small strided
        #     row copies (vst work, hidden under MXU slack — no placement matmul) ---
        pad1_ref[Cin:Ccat, :] = jnp.zeros((Cskip, PADW), bf16)
        for h in range(Hs):
            c0 = (h + 1) * Wp + 1
            pad1_ref[Cin:Ccat, c0:c0 + Ws] = (
                skip_ref[0, :, h * Ws:(h + 1) * Ws].astype(bf16))

        # --- conv1: im2col from the padded VMEM image -> one K=9*Ccat bf16 matmul,
        #     fused BN shift + ReLU epilogue in f32 ---
        for t in range(9):
            off = (t // 3) * Wp + (t % 3)
            patch1_ref[t * Ccat:(t + 1) * Ccat, :] = pad1_ref[:, off:off + SL]
        y1 = jnp.dot(w1_ref[...], patch1_ref[...], preferred_element_type=f32)
        y1 = jnp.maximum(y1 + b1_ref[...], 0.0) * mask_ref[...]          # (C1, SL)

        # --- re-pad conv1 output for conv2: the wide layout drops into the padded
        #     layout at a single contiguous offset (junk cols -> padding positions,
        #     already zeroed by the mask) ---
        pad2_ref[...] = jnp.zeros_like(pad2_ref)
        pad2_ref[:, Wp + 1:Wp + 1 + SL] = y1.astype(bf16)

        # --- conv2 (same scheme) ---
        for t in range(9):
            off = (t // 3) * Wp + (t % 3)
            patch2_ref[t * C1:(t + 1) * C1, :] = pad2_ref[:, off:off + SL]
        y2 = jnp.dot(w2_ref[...], patch2_ref[...], preferred_element_type=f32)
        y2 = jnp.maximum(y2 + b2_ref[...], 0.0)

        # --- single lane-dense (SL-wide) store; wrapper drops the junk columns ---
        o_ref[0] = y2.astype(o_ref.dtype)

    out_wide = pl.pallas_call(
        kernel,
        out_shape=jax.ShapeDtypeStruct((N, C2, SL), x.dtype),
        grid=(N,),
        in_specs=[
            pl.BlockSpec((1, Cin, HWin), lambda n: (n, 0, 0)),   # x, per batch (bf16)
            pl.BlockSpec((1, Cskip, HW), lambda n: (n, 0, 0)),   # skip, per batch
            pl.BlockSpec((HWin, PADW), lambda n: (0, 0)),        # padded bilinear matrix
            pl.BlockSpec((1, SL), lambda n: (0, 0)),             # valid-column mask
            pl.BlockSpec((C1, 9 * Ccat), lambda n: (0, 0)),      # conv1 weights (BN-folded, bf16)
            pl.BlockSpec((C1, 1), lambda n: (0, 0)),             # conv1 BN shift
            pl.BlockSpec((C2, 9 * C1), lambda n: (0, 0)),        # conv2 weights (BN-folded, bf16)
            pl.BlockSpec((C2, 1), lambda n: (0, 0)),             # conv2 BN shift
        ],
        out_specs=pl.BlockSpec((1, C2, SL), lambda n: (n, 0, 0)),
        scratch_shapes=[
            pltpu.VMEM((Ccat, PADW), jnp.bfloat16),    # padded (upsampled-x ++ skip) image
            pltpu.VMEM((C1, PADW), jnp.bfloat16),      # padded conv1 output
            pltpu.VMEM((9 * Ccat, SL), jnp.bfloat16),  # conv1 im2col patches
            pltpu.VMEM((9 * C1, SL), jnp.bfloat16),    # conv2 im2col patches
        ],
        compiler_params=pltpu.CompilerParams(
            dimension_semantics=("parallel",),         # v7x: one batch per TensorCore
        ),
    )(x.reshape(N, Cin, HWin).astype(jnp.bfloat16),
      skip.reshape(N, Cskip, HW),
      jnp.asarray(r_pad, jnp.bfloat16),
      jnp.asarray(valid, jnp.float32),
      params["w1_mat"], params["b1"], params["w2_mat"], params["b2"])

    # wide (row stride Ws+2) -> compact NCHW: drop the 2 junk columns per row.
    return out_wide.reshape(N, C2, Hs, Wp)[:, :, :, :Ws]


# Pure-JAX f32 reference (same math, XLA ops) for the correctness check.
def up_forward_ref(x, skip, params):
    Hs, Ws = skip.shape[-2:]
    rh = jnp.asarray(_interp_matrix_np(Hs, x.shape[-2]))
    rw = jnp.asarray(_interp_matrix_np(Ws, x.shape[-1]))
    xu = jnp.einsum("hp,ncpq,wq->nchw", rh, x, rw,
                    precision=jax.lax.Precision.HIGHEST)
    cat = jnp.concatenate([xu, skip], axis=1)
    y = jnp.transpose(cat, (0, 2, 3, 1))
    for w, s, b in ((params["w1_hwio"], params["scale1"], params["shift1"]),
                    (params["w2_hwio"], params["scale2"], params["shift2"])):
        y = jax.lax.conv_general_dilated(
            y, w, window_strides=(1, 1), padding="SAME",
            dimension_numbers=("NHWC", "HWIO", "NHWC"),
            precision=jax.lax.Precision.HIGHEST)
        y = jnp.maximum(y * s + b, 0.0)
    return jnp.transpose(y, (0, 3, 1, 2))


if __name__ == "__main__":
    key = jax.random.PRNGKey(0)
    kx, ks, kp = jax.random.split(key, 3)

    # x: decoder feature (N, in_chnls, 8, 8); skip: encoder feature (N, skip_chnls, 16, 16)
    N, in_chnls, skip_chnls, out_chnls = 2, 16, 16, 32
    x = jax.random.normal(kx, (N, in_chnls, 8, 8), jnp.float32)
    skip = jax.random.normal(ks, (N, skip_chnls, 16, 16), jnp.float32)
    params = make_up_params(kp, in_chnls, out_chnls, skip_chnls)

    up = jax.jit(up_forward)
    out = jax.block_until_ready(up(x, skip, params))
    assert out.shape == (N, out_chnls, 16, 16), out.shape

    ref = jax.block_until_ready(up_forward_ref(x, skip, params))
    max_err = float(jnp.max(jnp.abs(out - ref)))
    # Kernel matmuls use bf16 operands (f32 accumulation) per the perf review;
    # vs the f32 reference the expected max deviation is ~1e-2 for these
    # O(1)-magnitude activations.  5e-2 leaves headroom while still catching
    # any indexing / padding bug (which would produce O(1) errors).
    assert max_err < 5e-2, f"mismatch vs reference: {max_err}"

    print("KERNEL_OK")
</pallas_src>

<mosaic_0001>
module attributes {stable_mosaic.version = 11 : i64} {
  func.func @kernel(%arg0: i32, %arg1: memref<1x16x64xbf16, #tpu.memory_space<vmem>>, %arg2: memref<1x16x256xf32, #tpu.memory_space<vmem>>, %arg3: memref<64x384xbf16, #tpu.memory_space<vmem>>, %arg4: memref<1x288xf32, #tpu.memory_space<vmem>>, %arg5: memref<32x288xbf16, #tpu.memory_space<vmem>>, %arg6: memref<32x1xf32, #tpu.memory_space<vmem>>, %arg7: memref<32x288xbf16, #tpu.memory_space<vmem>>, %arg8: memref<32x1xf32, #tpu.memory_space<vmem>>, %arg9: memref<1x32x288xf32, #tpu.memory_space<vmem>>, %arg10: memref<32x384xbf16, #tpu.memory_space<vmem>>, %arg11: memref<32x384xbf16, #tpu.memory_space<vmem>>, %arg12: memref<288x288xbf16, #tpu.memory_space<vmem>>, %arg13: memref<288x288xbf16, #tpu.memory_space<vmem>>) attributes {dimension_semantics = [#tpu.dimension_semantics<parallel>], iteration_bounds = array<i64: 2>, scalar_prefetch = 0 : i64, scratch_operands = 4 : i64, tpu.core_type = #tpu.core_type<tc>, window_params = [{transform_indices = @transform_0, window_bounds = array<i64: 1, 16, 64>}, {transform_indices = @transform_1, window_bounds = array<i64: 1, 16, 256>}, {pipeline_mode = #tpu.pipeline_mode<synchronous>, transform_indices = @transform_2, window_bounds = array<i64: 64, 384>}, {pipeline_mode = #tpu.pipeline_mode<synchronous>, transform_indices = @transform_3, window_bounds = array<i64: 1, 288>}, {pipeline_mode = #tpu.pipeline_mode<synchronous>, transform_indices = @transform_4, window_bounds = array<i64: 32, 288>}, {pipeline_mode = #tpu.pipeline_mode<synchronous>, transform_indices = @transform_5, window_bounds = array<i64: 32, 1>}, {pipeline_mode = #tpu.pipeline_mode<synchronous>, transform_indices = @transform_6, window_bounds = array<i64: 32, 288>}, {pipeline_mode = #tpu.pipeline_mode<synchronous>, transform_indices = @transform_7, window_bounds = array<i64: 32, 1>}, {transform_indices = @transform_8, window_bounds = array<i64: 1, 32, 288>}]} {
    %c0 = arith.constant 0 : index
    %c0_0 = arith.constant 0 : index
    %c0_1 = arith.constant 0 : index
    %0 = vector.load %arg1[%c0, %c0_0, %c0_1] : memref<1x16x64xbf16, #tpu.memory_space<vmem>>, vector<1x16x64xbf16>
    %1 = vector.shape_cast %0 : vector<1x16x64xbf16> to vector<16x64xbf16>
    %c0_2 = arith.constant 0 : index
    %c0_3 = arith.constant 0 : index
    %2 = vector.load %arg3[%c0_2, %c0_3] : memref<64x384xbf16, #tpu.memory_space<vmem>>, vector<64x384xbf16>
    %cst = arith.constant dense<0.000000e+00> : vector<16x384xf32>
    %3 = tpu.matmul %1, %2, %cst {dimension_numbers = #tpu.dot_dimension_numbers<[1], [0], [0], [1], [0, 0, 1, 1], [], []>} : vector<16x64xbf16>, vector<64x384xbf16>, vector<16x384xf32> -> vector<16x384xf32>
    %4 = arith.truncf %3 : vector<16x384xf32> to vector<16x384xbf16>
    %c0_4 = arith.constant 0 : index
    %c0_5 = arith.constant 0 : index
    %5 = vector.load %arg10[%c0_4, %c0_5] : memref<32x384xbf16, #tpu.memory_space<vmem>>, vector<16x384xbf16>
    tpu.vector_store %arg10[%c0_4, %c0_5], %4 {strides = array<i32>} : memref<32x384xbf16, #tpu.memory_space<vmem>>, vector<16x384xbf16>,
    %cst_6 = arith.constant 0.000000e+00 : bf16
    %6 = vector.broadcast %cst_6 : bf16 to vector<16x384xbf16>
    %c16 = arith.constant 16 : index
    %c0_7 = arith.constant 0 : index
    %7 = vector.load %arg10[%c16, %c0_7] : memref<32x384xbf16, #tpu.memory_space<vmem>>, vector<16x384xbf16>
    tpu.vector_store %arg10[%c16, %c0_7], %6 {strides = array<i32>} : memref<32x384xbf16, #tpu.memory_space<vmem>>, vector<16x384xbf16>,
    %c0_8 = arith.constant 0 : index
    %c0_9 = arith.constant 0 : index
    %c0_10 = arith.constant 0 : index
    %8 = vector.load %arg2[%c0_8, %c0_9, %c0_10] : memref<1x16x256xf32, #tpu.memory_space<vmem>>, vector<1x16x16xf32>
    %9 = vector.shape_cast %8 : vector<1x16x16xf32> to vector<16x16xf32>
    %10 = arith.truncf %9 : vector<16x16xf32> to vector<16x16xbf16>
    %c16_11 = arith.constant 16 : index
    %c19 = arith.constant 19 : index
    %11 = vector.load %arg10[%c16_11, %c19] : memref<32x384xbf16, #tpu.memory_space<vmem>>, vector<16x16xbf16>
    tpu.vector_store %arg10[%c16_11, %c19], %10 {strides = array<i32>} : memref<32x384xbf16, #tpu.memory_space<vmem>>, vector<16x16xbf16>,
    %c0_12 = arith.constant 0 : index
    %c0_13 = arith.constant 0 : index
    %c16_14 = arith.constant 16 : index
    %12 = vector.load %arg2[%c0_12, %c0_13, %c16_14] : memref<1x16x256xf32, #tpu.memory_space<vmem>>, vector<1x16x16xf32>
    %13 = vector.shape_cast %12 : vector<1x16x16xf32> to vector<16x16xf32>
    %14 = arith.truncf %13 : vector<16x16xf32> to vector<16x16xbf16>
    %c16_15 = arith.constant 16 : index
    %c37 = arith.constant 37 : index
    %15 = vector.load %arg10[%c16_15, %c37] : memref<32x384xbf16, #tpu.memory_space<vmem>>, vector<16x16xbf16>
    tpu.vector_store %arg10[%c16_15, %c37], %14 {strides = array<i32>} : memref<32x384xbf16, #tpu.memory_space<vmem>>, vector<16x16xbf16>,
    %c0_16 = arith.constant 0 : index
    %c0_17 = arith.constant 0 : index
    %c32 = arith.constant 32 : index
    %16 = vector.load %arg2[%c0_16, %c0_17, %c32] : memref<1x16x256xf32, #tpu.memory_space<vmem>>, vector<1x16x16xf32>
    %17 = vector.shape_cast %16 : vector<1x16x16xf32> to vector<16x16xf32>
    %18 = arith.truncf %17 : vector<16x16xf32> to vector<16x16xbf16>
    %c16_18 = arith.constant 16 : index
    %c55 = arith.constant 55 : index
    %19 = vector.load %arg10[%c16_18, %c55] : memref<32x384xbf16, #tpu.memory_space<vmem>>, vector<16x16xbf16>
    tpu.vector_store %arg10[%c16_18, %c55], %18 {strides = array<i32>} : memref<32x384xbf16, #tpu.memory_space<vmem>>, vector<16x16xbf16>,
    %c0_19 = arith.constant 0 : index
    %c0_20 = arith.constant 0 : index
    %c48 = arith.constant 48 : index
    %20 = vector.load %arg2[%c0_19, %c0_20, %c48] : memref<1x16x256xf32, #tpu.memory_space<vmem>>, vector<1x16x16xf32>
    %21 = vector.shape_cast %20 : vector<1x16x16xf32> to vector<16x16xf32>
    %22 = arith.truncf %21 : vector<16x16xf32> to vector<16x16xbf16>
    %c16_21 = arith.constant 16 : index
    %c73 = arith.constant 73 : index
    %23 = vector.load %arg10[%c16_21, %c73] : memref<32x384xbf16, #tpu.memory_space<vmem>>, vector<16x16xbf16>
    tpu.vector_store %arg10[%c16_21, %c73], %22 {strides = array<i32>} : memref<32x384xbf16, #tpu.memory_space<vmem>>, vector<16x16xbf16>,
    %c0_22 = arith.constant 0 : index
    %c0_23 = arith.constant 0 : index
    %c64 = arith.constant 64 : index
    %24 = vector.load %arg2[%c0_22, %c0_23, %c64] : memref<1x16x256xf32, #tpu.memory_space<vmem>>, vector<1x16x16xf32>
    %25 = vector.shape_cast %24 : vector<1x16x16xf32> to vector<16x16xf32>
    %26 = arith.truncf %25 : vector<16x16xf32> to vector<16x16xbf16>
    %c16_24 = arith.constant 16 : index
    %c91 = arith.constant 91 : index
    %27 = vector.load %arg10[%c16_24, %c91] : memref<32x384xbf16, #tpu.memory_space<vmem>>, vector<16x16xbf16>
    tpu.vector_store %arg10[%c16_24, %c91], %26 {strides = array<i32>} : memref<32x384xbf16, #tpu.memory_space<vmem>>, vector<16x16xbf16>,
    %c0_25 = arith.constant 0 : index
    %c0_26 = arith.constant 0 : index
    %c80 = arith.constant 80 : index
    %28 = vector.load %arg2[%c0_25, %c0_26, %c80] : memref<1x16x256xf32, #tpu.memory_space<vmem>>, vector<1x16x16xf32>
    %29 = vector.shape_cast %28 : vector<1x16x16xf32> to vector<16x16xf32>
    %30 = arith.truncf %29 : vector<16x16xf32> to vector<16x16xbf16>
    %c16_27 = arith.constant 16 : index
    %c109 = arith.constant 109 : index
    %31 = vector.load %arg10[%c16_27, %c109] : memref<32x384xbf16, #tpu.memory_space<vmem>>, vector<16x16xbf16>
    tpu.vector_store %arg10[%c16_27, %c109], %30 {strides = array<i32>} : memref<32x384xbf16, #tpu.memory_space<vmem>>, vector<16x16xbf16>,
    %c0_28 = arith.constant 0 : index
    %c0_29 = arith.constant 0 : index
    %c96 = arith.constant 96 : index
    %32 = vector.load %arg2[%c0_28, %c0_29, %c96] : memref<1x16x256xf32, #tpu.memory_space<vmem>>, vector<1x16x16xf32>
    %33 = vector.shape_cast %32 : vector<1x16x16xf32> to vector<16x16xf32>
    %34 = arith.truncf %33 : vector<16x16xf32> to vector<16x16xbf16>
    %c16_30 = arith.constant 16 : index
    %c127 = arith.constant 127 : index
    %35 = vector.load %arg10[%c16_30, %c127] : memref<32x384xbf16, #tpu.memory_space<vmem>>, vector<16x16xbf16>
    tpu.vector_store %arg10[%c16_30, %c127], %34 {strides = array<i32>} : memref<32x384xbf16, #tpu.memory_space<vmem>>, vector<16x16xbf16>,
    %c0_31 = arith.constant 0 : index
    %c0_32 = arith.constant 0 : index
    %c112 = arith.constant 112 : index
    %36 = vector.load %arg2[%c0_31, %c0_32, %c112] : memref<1x16x256xf32, #tpu.memory_space<vmem>>, vector<1x16x16xf32>
    %37 = vector.shape_cast %36 : vector<1x16x16xf32> to vector<16x16xf32>
    %38 = arith.truncf %37 : vector<16x16xf32> to vector<16x16xbf16>
    %c16_33 = arith.constant 16 : index
    %c145 = arith.constant 145 : index
    %39 = vector.load %arg10[%c16_33, %c145] : memref<32x384xbf16, #tpu.memory_space<vmem>>, vector<16x16xbf16>
    tpu.vector_store %arg10[%c16_33, %c145], %38 {strides = array<i32>} : memref<32x384xbf16, #tpu.memory_space<vmem>>, vector<16x16xbf16>,
    %c0_34 = arith.constant 0 : index
    %c0_35 = arith.constant 0 : index
    %c128 = arith.constant 128 : index
    %40 = vector.load %arg2[%c0_34, %c0_35, %c128] : memref<1x16x256xf32, #tpu.memory_space<vmem>>, vector<1x16x16xf32>
    %41 = vector.shape_cast %40 : vector<1x16x16xf32> to vector<16x16xf32>
    %42 = arith.truncf %41 : vector<16x16xf32> to vector<16x16xbf16>
    %c16_36 = arith.constant 16 : index
    %c163 = arith.constant 163 : index
    %43 = vector.load %arg10[%c16_36, %c163] : memref<32x384xbf16, #tpu.memory_space<vmem>>, vector<16x16xbf16>
    tpu.vector_store %arg10[%c16_36, %c163], %42 {strides = array<i32>} : memref<32x384xbf16, #tpu.memory_space<vmem>>, vector<16x16xbf16>,
    %c0_37 = arith.constant 0 : index
    %c0_38 = arith.constant 0 : index
    %c144 = arith.constant 144 : index
    %44 = vector.load %arg2[%c0_37, %c0_38, %c144] : memref<1x16x256xf32, #tpu.memory_space<vmem>>, vector<1x16x16xf32>
    %45 = vector.shape_cast %44 : vector<1x16x16xf32> to vector<16x16xf32>
    %46 = arith.truncf %45 : vector<16x16xf32> to vector<16x16xbf16>
    %c16_39 = arith.constant 16 : index
    %c181 = arith.constant 181 : index
    %47 = vector.load %arg10[%c16_39, %c181] : memref<32x384xbf16, #tpu.memory_space<vmem>>, vector<16x16xbf16>
    tpu.vector_store %arg10[%c16_39, %c181], %46 {strides = array<i32>} : memref<32x384xbf16, #tpu.memory_space<vmem>>, vector<16x16xbf16>,
    %c0_40 = arith.constant 0 : index
    %c0_41 = arith.constant 0 : index
    %c160 = arith.constant 160 : index
    %48 = vector.load %arg2[%c0_40, %c0_41, %c160] : memref<1x16x256xf32, #tpu.memory_space<vmem>>, vector<1x16x16xf32>
    %49 = vector.shape_cast %48 : vector<1x16x16xf32> to vector<16x16xf32>
    %50 = arith.truncf %49 : vector<16x16xf32> to vector<16x16xbf16>
    %c16_42 = arith.constant 16 : index
    %c199 = arith.constant 199 : index
    %51 = vector.load %arg10[%c16_42, %c199] : memref<32x384xbf16, #tpu.memory_space<vmem>>, vector<16x16xbf16>
    tpu.vector_store %arg10[%c16_42, %c199], %50 {strides = array<i32>} : memref<32x384xbf16, #tpu.memory_space<vmem>>, vector<16x16xbf16>,
    %c0_43 = arith.constant 0 : index
    %c0_44 = arith.constant 0 : index
    %c176 = arith.constant 176 : index
    %52 = vector.load %arg2[%c0_43, %c0_44, %c176] : memref<1x16x256xf32, #tpu.memory_space<vmem>>, vector<1x16x16xf32>
    %53 = vector.shape_cast %52 : vector<1x16x16xf32> to vector<16x16xf32>
    %54 = arith.truncf %53 : vector<16x16xf32> to vector<16x16xbf16>
    %c16_45 = arith.constant 16 : index
    %c217 = arith.constant 217 : index
    %55 = vector.load %arg10[%c16_45, %c217] : memref<32x384xbf16, #tpu.memory_space<vmem>>, vector<16x16xbf16>
    tpu.vector_store %arg10[%c16_45, %c217], %54 {strides = array<i32>} : memref<32x384xbf16, #tpu.memory_space<vmem>>, vector<16x16xbf16>,
    %c0_46 = arith.constant 0 : index
    %c0_47 = arith.constant 0 : index
    %c192 = arith.constant 192 : index
    %56 = vector.load %arg2[%c0_46, %c0_47, %c192] : memref<1x16x256xf32, #tpu.memory_space<vmem>>, vector<1x16x16xf32>
    %57 = vector.shape_cast %56 : vector<1x16x16xf32> to vector<16x16xf32>
    %58 = arith.truncf %57 : vector<16x16xf32> to vector<16x16xbf16>
    %c16_48 = arith.constant 16 : index
    %c235 = arith.constant 235 : index
    %59 = vector.load %arg10[%c16_48, %c235] : memref<32x384xbf16, #tpu.memory_space<vmem>>, vector<16x16xbf16>
    tpu.vector_store %arg10[%c16_48, %c235], %58 {strides = array<i32>} : memref<32x384xbf16, #tpu.memory_space<vmem>>, vector<16x16xbf16>,
    %c0_49 = arith.constant 0 : index
    %c0_50 = arith.constant 0 : index
    %c208 = arith.constant 208 : index
    %60 = vector.load %arg2[%c0_49, %c0_50, %c208] : memref<1x16x256xf32, #tpu.memory_space<vmem>>, vector<1x16x16xf32>
    %61 = vector.shape_cast %60 : vector<1x16x16xf32> to vector<16x16xf32>
    %62 = arith.truncf %61 : vector<16x16xf32> to vector<16x16xbf16>
    %c16_51 = arith.constant 16 : index
    %c253 = arith.constant 253 : index
    %63 = vector.load %arg10[%c16_51, %c253] : memref<32x384xbf16, #tpu.memory_space<vmem>>, vector<16x16xbf16>
    tpu.vector_store %arg10[%c16_51, %c253], %62 {strides = array<i32>} : memref<32x384xbf16, #tpu.memory_space<vmem>>, vector<16x16xbf16>,
    %c0_52 = arith.constant 0 : index
    %c0_53 = arith.constant 0 : index
    %c224 = arith.constant 224 : index
    %64 = vector.load %arg2[%c0_52, %c0_53, %c224] : memref<1x16x256xf32, #tpu.memory_space<vmem>>, vector<1x16x16xf32>
    %65 = vector.shape_cast %64 : vector<1x16x16xf32> to vector<16x16xf32>
    %66 = arith.truncf %65 : vector<16x16xf32> to vector<16x16xbf16>
    %c16_54 = arith.constant 16 : index
    %c271 = arith.constant 271 : index
    %67 = vector.load %arg10[%c16_54, %c271] : memref<32x384xbf16, #tpu.memory_space<vmem>>, vector<16x16xbf16>
    tpu.vector_store %arg10[%c16_54, %c271], %66 {strides = array<i32>} : memref<32x384xbf16, #tpu.memory_space<vmem>>, vector<16x16xbf16>,
    %c0_55 = arith.constant 0 : index
    %c0_56 = arith.constant 0 : index
    %c240 = arith.constant 240 : index
    %68 = vector.load %arg2[%c0_55, %c0_56, %c240] : memref<1x16x256xf32, #tpu.memory_space<vmem>>, vector<1x16x16xf32>
    %69 = vector.shape_cast %68 : vector<1x16x16xf32> to vector<16x16xf32>
    %70 = arith.truncf %69 : vector<16x16xf32> to vector<16x16xbf16>
    %c16_57 = arith.constant 16 : index
    %c289 = arith.constant 289 : index
    %71 = vector.load %arg10[%c16_57, %c289] : memref<32x384xbf16, #tpu.memory_space<vmem>>, vector<16x16xbf16>
    tpu.vector_store %arg10[%c16_57, %c289], %70 {strides = array<i32>} : memref<32x384xbf16, #tpu.memory_space<vmem>>, vector<16x16xbf16>,
    %c0_58 = arith.constant 0 : index
    %c0_59 = arith.constant 0 : index
    %72 = vector.load %arg10[%c0_58, %c0_59] : memref<32x384xbf16, #tpu.memory_space<vmem>>, vector<32x288xbf16>
    %c0_60 = arith.constant 0 : index
    %c0_61 = arith.constant 0 : index
    %73 = vector.load %arg12[%c0_60, %c0_61] : memref<288x288xbf16, #tpu.memory_space<vmem>>, vector<32x288xbf16>
    tpu.vector_store %arg12[%c0_60, %c0_61], %72 {strides = array<i32>} : memref<288x288xbf16, #tpu.memory_space<vmem>>, vector<32x288xbf16>,
    %c0_62 = arith.constant 0 : index
    %c1 = arith.constant 1 : index
    %74 = vector.load %arg10[%c0_62, %c1] : memref<32x384xbf16, #tpu.memory_space<vmem>>, vector<32x288xbf16>
    %c32_63 = arith.constant 32 : index
    %c0_64 = arith.constant 0 : index
    %75 = vector.load %arg12[%c32_63, %c0_64] : memref<288x288xbf16, #tpu.memory_space<vmem>>, vector<32x288xbf16>
    tpu.vector_store %arg12[%c32_63, %c0_64], %74 {strides = array<i32>} : memref<288x288xbf16, #tpu.memory_space<vmem>>, vector<32x288xbf16>,
    %c0_65 = arith.constant 0 : index
    %c2 = arith.constant 2 : index
    %76 = vector.load %arg10[%c0_65, %c2] : memref<32x384xbf16, #tpu.memory_space<vmem>>, vector<32x288xbf16>
    %c64_66 = arith.constant 64 : index
    %c0_67 = arith.constant 0 : index
    %77 = vector.load %arg12[%c64_66, %c0_67] : memref<288x288xbf16, #tpu.memory_space<vmem>>, vector<32x288xbf16>
    tpu.vector_store %arg12[%c64_66, %c0_67], %76 {strides = array<i32>} : memref<288x288xbf16, #tpu.memory_space<vmem>>, vector<32x288xbf16>,
    %c0_68 = arith.constant 0 : index
    %c18 = arith.constant 18 : index
    %78 = vector.load %arg10[%c0_68, %c18] : memref<32x384xbf16, #tpu.memory_space<vmem>>, vector<32x288xbf16>
    %c96_69 = arith.constant 96 : index
    %c0_70 = arith.constant 0 : index
    %79 = vector.load %arg12[%c96_69, %c0_70] : memref<288x288xbf16, #tpu.memory_space<vmem>>, vector<32x288xbf16>
    tpu.vector_store %arg12[%c96_69, %c0_70], %78 {strides = array<i32>} : memref<288x288xbf16, #tpu.memory_space<vmem>>, vector<32x288xbf16>,
    %c0_71 = arith.constant 0 : index
    %c19_72 = arith.constant 19 : index
    %80 = vector.load %arg10[%c0_71, %c19_72] : memref<32x384xbf16, #tpu.memory_space<vmem>>, vector<32x288xbf16>
    %c128_73 = arith.constant 128 : index
    %c0_74 = arith.constant 0 : index
    %81 = vector.load %arg12[%c128_73, %c0_74] : memref<288x288xbf16, #tpu.memory_space<vmem>>, vector<32x288xbf16>
    tpu.vector_store %arg12[%c128_73, %c0_74], %80 {strides = array<i32>} : memref<288x288xbf16, #tpu.memory_space<vmem>>, vector<32x288xbf16>,
    %c0_75 = arith.constant 0 : index
    %c20 = arith.constant 20 : index
    %82 = vector.load %arg10[%c0_75, %c20] : memref<32x384xbf16, #tpu.memory_space<vmem>>, vector<32x288xbf16>
    %c160_76 = arith.constant 160 : index
    %c0_77 = arith.constant 0 : index
    %83 = vector.load %arg12[%c160_76, %c0_77] : memref<288x288xbf16, #tpu.memory_space<vmem>>, vector<32x288xbf16>
    tpu.vector_store %arg12[%c160_76, %c0_77], %82 {strides = array<i32>} : memref<288x288xbf16, #tpu.memory_space<vmem>>, vector<32x288xbf16>,
    %c0_78 = arith.constant 0 : index
    %c36 = arith.constant 36 : index
    %84 = vector.load %arg10[%c0_78, %c36] : memref<32x384xbf16, #tpu.memory_space<vmem>>, vector<32x288xbf16>
    %c192_79 = arith.constant 192 : index
    %c0_80 = arith.constant 0 : index
    %85 = vector.load %arg12[%c192_79, %c0_80] : memref<288x288xbf16, #tpu.memory_space<vmem>>, vector<32x288xbf16>
    tpu.vector_store %arg12[%c192_79, %c0_80], %84 {strides = array<i32>} : memref<288x288xbf16, #tpu.memory_space<vmem>>, vector<32x288xbf16>,
    %c0_81 = arith.constant 0 : index
    %c37_82 = arith.constant 37 : index
    %86 = vector.load %arg10[%c0_81, %c37_82] : memref<32x384xbf16, #tpu.memory_space<vmem>>, vector<32x288xbf16>
    %c224_83 = arith.constant 224 : index
    %c0_84 = arith.constant 0 : index
    %87 = vector.load %arg12[%c224_83, %c0_84] : memref<288x288xbf16, #tpu.memory_space<vmem>>, vector<32x288xbf16>
    tpu.vector_store %arg12[%c224_83, %c0_84], %86 {strides = array<i32>} : memref<288x288xbf16, #tpu.memory_space<vmem>>, vector<32x288xbf16>,
    %c0_85 = arith.constant 0 : index
    %c38 = arith.constant 38 : index
    %88 = vector.load %arg10[%c0_85, %c38] : memref<32x384xbf16, #tpu.memory_space<vmem>>, vector<32x288xbf16>
    %c256 = arith.constant 256 : index
    %c0_86 = arith.constant 0 : index
    %89 = vector.load %arg12[%c256, %c0_86] : memref<288x288xbf16, #tpu.memory_space<vmem>>, vector<32x288xbf16>
    tpu.vector_store %arg12[%c256, %c0_86], %88 {strides = array<i32>} : memref<288x288xbf16, #tpu.memory_space<vmem>>, vector<32x288xbf16>,
    %c0_87 = arith.constant 0 : index
    %c0_88 = arith.constant 0 : index
    %90 = vector.load %arg5[%c0_87, %c0_88] : memref<32x288xbf16, #tpu.memory_space<vmem>>, vector<32x288xbf16>
    %c0_89 = arith.constant 0 : index
    %c0_90 = arith.constant 0 : index
    %91 = vector.load %arg12[%c0_89, %c0_90] : memref<288x288xbf16, #tpu.memory_space<vmem>>, vector<288x288xbf16>
    %cst_91 = arith.constant dense<0.000000e+00> : vector<32x288xf32>
    %92 = tpu.matmul %90, %91, %cst_91 {dimension_numbers = #tpu.dot_dimension_numbers<[1], [0], [0], [1], [0, 0, 1, 1], [], []>} : vector<32x288xbf16>, vector<288x288xbf16>, vector<32x288xf32> -> vector<32x288xf32>
    %c0_92 = arith.constant 0 : index
    %c0_93 = arith.constant 0 : index
    %93 = vector.load %arg6[%c0_92, %c0_93] : memref<32x1xf32, #tpu.memory_space<vmem>>, vector<32x1xf32>
    %94 = vector.broadcast %93 : vector<32x1xf32> to vector<32x288xf32>
    %95 = arith.addf %92, %94 : vector<32x288xf32>
    %cst_94 = arith.constant 0.000000e+00 : f32
    %96 = vector.broadcast %cst_94 : f32 to vector<32x288xf32>
    %97 = arith.maximumf %95, %96 : vector<32x288xf32>
    %c0_95 = arith.constant 0 : index
    %c0_96 = arith.constant 0 : index
    %98 = vector.load %arg4[%c0_95, %c0_96] : memref<1x288xf32, #tpu.memory_space<vmem>>, vector<1x288xf32>
    %99 = vector.broadcast %98 : vector<1x288xf32> to vector<32x288xf32>
    %100 = arith.mulf %97, %99 : vector<32x288xf32>
    %cst_97 = arith.constant 0.000000e+00 : bf16
    %101 = vector.broadcast %cst_97 : bf16 to vector<32x384xbf16>
    %c0_98 = arith.constant 0 : index
    %c0_99 = arith.constant 0 : index
    %102 = vector.load %arg11[%c0_98, %c0_99] : memref<32x384xbf16, #tpu.memory_space<vmem>>, vector<32x384xbf16>
    tpu.vector_store %arg11[%c0_98, %c0_99], %101 {strides = array<i32>} : memref<32x384xbf16, #tpu.memory_space<vmem>>, vector<32x384xbf16>,
    %103 = arith.truncf %100 : vector<32x288xf32> to vector<32x288xbf16>
    %c0_100 = arith.constant 0 : index
    %c19_101 = arith.constant 19 : index
    %104 = vector.load %arg11[%c0_100, %c19_101] : memref<32x384xbf16, #tpu.memory_space<vmem>>, vector<32x288xbf16>
    tpu.vector_store %arg11[%c0_100, %c19_101], %103 {strides = array<i32>} : memref<32x384xbf16, #tpu.memory_space<vmem>>, vector<32x288xbf16>,
    %c0_102 = arith.constant 0 : index
    %c0_103 = arith.constant 0 : index
    %105 = vector.load %arg11[%c0_102, %c0_103] : memref<32x384xbf16, #tpu.memory_space<vmem>>, vector<32x288xbf16>
    %c0_104 = arith.constant 0 : index
    %c0_105 = arith.constant 0 : index
    %106 = vector.load %arg13[%c0_104, %c0_105] : memref<288x288xbf16, #tpu.memory_space<vmem>>, vector<32x288xbf16>
    tpu.vector_store %arg13[%c0_104, %c0_105], %105 {strides = array<i32>} : memref<288x288xbf16, #tpu.memory_space<vmem>>, vector<32x288xbf16>,
    %c0_106 = arith.constant 0 : index
    %c1_107 = arith.constant 1 : index
    %107 = vector.load %arg11[%c0_106, %c1_107] : memref<32x384xbf16, #tpu.memory_space<vmem>>, vector<32x288xbf16>
    %c32_108 = arith.constant 32 : index
    %c0_109 = arith.constant 0 : index
    %108 = vector.load %arg13[%c32_108, %c0_109] : memref<288x288xbf16, #tpu.memory_space<vmem>>, vector<32x288xbf16>
    tpu.vector_store %arg13[%c32_108, %c0_109], %107 {strides = array<i32>} : memref<288x288xbf16, #tpu.memory_space<vmem>>, vector<32x288xbf16>,
    %c0_110 = arith.constant 0 : index
    %c2_111 = arith.constant 2 : index
    %109 = vector.load %arg11[%c0_110, %c2_111] : memref<32x384xbf16, #tpu.memory_space<vmem>>, vector<32x288xbf16>
    %c64_112 = arith.constant 64 : index
    %c0_113 = arith.constant 0 : index
    %110 = vector.load %arg13[%c64_112, %c0_113] : memref<288x288xbf16, #tpu.memory_space<vmem>>, vector<32x288xbf16>
    tpu.vector_store %arg13[%c64_112, %c0_113], %109 {strides = array<i32>} : memref<288x288xbf16, #tpu.memory_space<vmem>>, vector<32x288xbf16>,
    %c0_114 = arith.constant 0 : index
    %c18_115 = arith.constant 18 : index
    %111 = vector.load %arg11[%c0_114, %c18_115] : memref<32x384xbf16, #tpu.memory_space<vmem>>, vector<32x288xbf16>
    %c96_116 = arith.constant 96 : index
    %c0_117 = arith.constant 0 : index
    %112 = vector.load %arg13[%c96_116, %c0_117] : memref<288x288xbf16, #tpu.memory_space<vmem>>, vector<32x288xbf16>
    tpu.vector_store %arg13[%c96_116, %c0_117], %111 {strides = array<i32>} : memref<288x288xbf16, #tpu.memory_space<vmem>>, vector<32x288xbf16>,
    %c0_118 = arith.constant 0 : index
    %c19_119 = arith.constant 19 : index
    %113 = vector.load %arg11[%c0_118, %c19_119] : memref<32x384xbf16, #tpu.memory_space<vmem>>, vector<32x288xbf16>
    %c128_120 = arith.constant 128 : index
    %c0_121 = arith.constant 0 : index
    %114 = vector.load %arg13[%c128_120, %c0_121] : memref<288x288xbf16, #tpu.memory_space<vmem>>, vector<32x288xbf16>
    tpu.vector_store %arg13[%c128_120, %c0_121], %113 {strides = array<i32>} : memref<288x288xbf16, #tpu.memory_space<vmem>>, vector<32x288xbf16>,
    %c0_122 = arith.constant 0 : index
    %c20_123 = arith.constant 20 : index
    %115 = vector.load %arg11[%c0_122, %c20_123] : memref<32x384xbf16, #tpu.memory_space<vmem>>, vector<32x288xbf16>
    %c160_124 = arith.constant 160 : index
    %c0_125 = arith.constant 0 : index
    %116 = vector.load %arg13[%c160_124, %c0_125] : memref<288x288xbf16, #tpu.memory_space<vmem>>, vector<32x288xbf16>
    tpu.vector_store %arg13[%c160_124, %c0_125], %115 {strides = array<i32>} : memref<288x288xbf16, #tpu.memory_space<vmem>>, vector<32x288xbf16>,
    %c0_126 = arith.constant 0 : index
    %c36_127 = arith.constant 36 : index
    %117 = vector.load %arg11[%c0_126, %c36_127] : memref<32x384xbf16, #tpu.memory_space<vmem>>, vector<32x288xbf16>
    %c192_128 = arith.constant 192 : index
    %c0_129 = arith.constant 0 : index
    %118 = vector.load %arg13[%c192_128, %c0_129] : memref<288x288xbf16, #tpu.memory_space<vmem>>, vector<32x288xbf16>
    tpu.vector_store %arg13[%c192_128, %c0_129], %117 {strides = array<i32>} : memref<288x288xbf16, #tpu.memory_space<vmem>>, vector<32x288xbf16>,
    %c0_130 = arith.constant 0 : index
    %c37_131 = arith.constant 37 : index
    %119 = vector.load %arg11[%c0_130, %c37_131] : memref<32x384xbf16, #tpu.memory_space<vmem>>, vector<32x288xbf16>
    %c224_132 = arith.constant 224 : index
    %c0_133 = arith.constant 0 : index
    %120 = vector.load %arg13[%c224_132, %c0_133] : memref<288x288xbf16, #tpu.memory_space<vmem>>, vector<32x288xbf16>
    tpu.vector_store %arg13[%c224_132, %c0_133], %119 {strides = array<i32>} : memref<288x288xbf16, #tpu.memory_space<vmem>>, vector<32x288xbf16>,
    %c0_134 = arith.constant 0 : index
    %c38_135 = arith.constant 38 : index
    %121 = vector.load %arg11[%c0_134, %c38_135] : memref<32x384xbf16, #tpu.memory_space<vmem>>, vector<32x288xbf16>
    %c256_136 = arith.constant 256 : index
    %c0_137 = arith.constant 0 : index
    %122 = vector.load %arg13[%c256_136, %c0_137] : memref<288x288xbf16, #tpu.memory_space<vmem>>, vector<32x288xbf16>
    tpu.vector_store %arg13[%c256_136, %c0_137], %121 {strides = array<i32>} : memref<288x288xbf16, #tpu.memory_space<vmem>>, vector<32x288xbf16>,
    %c0_138 = arith.constant 0 : index
    %c0_139 = arith.constant 0 : index
    %123 = vector.load %arg7[%c0_138, %c0_139] : memref<32x288xbf16, #tpu.memory_space<vmem>>, vector<32x288xbf16>
    %c0_140 = arith.constant 0 : index
    %c0_141 = arith.constant 0 : index
    %124 = vector.load %arg13[%c0_140, %c0_141] : memref<288x288xbf16, #tpu.memory_space<vmem>>, vector<288x288xbf16>
    %cst_142 = arith.constant dense<0.000000e+00> : vector<32x288xf32>
    %125 = tpu.matmul %123, %124, %cst_142 {dimension_numbers = #tpu.dot_dimension_numbers<[1], [0], [0], [1], [0, 0, 1, 1], [], []>} : vector<32x288xbf16>, vector<288x288xbf16>, vector<32x288xf32> -> vector<32x288xf32>
    %c0_143 = arith.constant 0 : index
    %c0_144 = arith.constant 0 : index
    %126 = vector.load %arg8[%c0_143, %c0_144] : memref<32x1xf32, #tpu.memory_space<vmem>>, vector<32x1xf32>
    %127 = vector.broadcast %126 : vector<32x1xf32> to vector<32x288xf32>
    %128 = arith.addf %125, %127 : vector<32x288xf32>
    %cst_145 = arith.constant 0.000000e+00 : f32
    %129 = vector.broadcast %cst_145 : f32 to vector<32x288xf32>
    %130 = arith.maximumf %128, %129 : vector<32x288xf32>
    %c0_146 = arith.constant 0 : index
    %c0_147 = arith.constant 0 : index
    %c0_148 = arith.constant 0 : index
    %131 = vector.load %arg9[%c0_146, %c0_147, %c0_148] : memref<1x32x288xf32, #tpu.memory_space<vmem>>, vector<1x32x288xf32>
    %132 = vector.shape_cast %131 : vector<1x32x288xf32> to vector<32x288xf32>
    %133 = vector.shape_cast %130 : vector<32x288xf32> to vector<1x32x288xf32>
    tpu.vector_store %arg9[%c0_146, %c0_147, %c0_148], %133 {strides = array<i32>} : memref<1x32x288xf32, #tpu.memory_space<vmem>>, vector<1x32x288xf32>,
    return
  }
  func.func @transform_0(%arg0: i32) -> (i32, i32, i32) {
    %c0_i32 = arith.constant 0 : i32
    %c0_i32_0 = arith.constant 0 : i32
    %c0_i32_1 = arith.constant 0 : i32
    return %arg0, %c0_i32, %c0_i32_0 : i32, i32, i32
  }
  func.func @transform_1(%arg0: i32) -> (i32, i32, i32) {
    %c0_i32 = arith.constant 0 : i32
    %c0_i32_0 = arith.constant 0 : i32
    %c0_i32_1 = arith.constant 0 : i32
    return %arg0, %c0_i32, %c0_i32_0 : i32, i32, i32
  }
  func.func @transform_2(%arg0: i32) -> (i32, i32) {
    %c0_i32 = arith.constant 0 : i32
    %c0_i32_0 = arith.constant 0 : i32
    %c0_i32_1 = arith.constant 0 : i32
    return %c0_i32, %c0_i32_0 : i32, i32
  }
  func.func @transform_3(%arg0: i32) -> (i32, i32) {
    %c0_i32 = arith.constant 0 : i32
    %c0_i32_0 = arith.constant 0 : i32
    %c0_i32_1 = arith.constant 0 : i32
    return %c0_i32, %c0_i32_0 : i32, i32
  }
  func.func @transform_4(%arg0: i32) -> (i32, i32) {
    %c0_i32 = arith.constant 0 : i32
    %c0_i32_0 = arith.constant 0 : i32
    %c0_i32_1 = arith.constant 0 : i32
    return %c0_i32, %c0_i32_0 : i32, i32
  }
  func.func @transform_5(%arg0: i32) -> (i32, i32) {
    %c0_i32 = arith.constant 0 : i32
    %c0_i32_0 = arith.constant 0 : i32
    %c0_i32_1 = arith.constant 0 : i32
    return %c0_i32, %c0_i32_0 : i32, i32
  }
  func.func @transform_6(%arg0: i32) -> (i32, i32) {
    %c0_i32 = arith.constant 0 : i32
    %c0_i32_0 = arith.constant 0 : i32
    %c0_i32_1 = arith.constant 0 : i32
    return %c0_i32, %c0_i32_0 : i32, i32
  }
  func.func @transform_7(%arg0: i32) -> (i32, i32) {
    %c0_i32 = arith.constant 0 : i32
    %c0_i32_0 = arith.constant 0 : i32
    %c0_i32_1 = arith.constant 0 : i32
    return %c0_i32, %c0_i32_0 : i32, i32
  }
  func.func @transform_8(%arg0: i32) -> (i32, i32, i32) {
    %c0_i32 = arith.constant 0 : i32
    %c0_i32_0 = arith.constant 0 : i32
    %c0_i32_1 = arith.constant 0 : i32
    return %arg0, %c0_i32, %c0_i32_0 : i32, i32, i32
  }
}

</mosaic_0001>

<bundles_post_ra>
// kernel: up_forward.1
= control target key start
LH: loop header
LB: loop body
LE: loop exit
PB: predicated region body
PF: predicated region fallthrough
CT: control target
= control target key end

     0   :  { %s2494_s27 = smov 0   ;;  %s2937_s0 = inlined_call_operand.vmem [shape: bf16[2,16,64], index: 0, kind: input, shape index: {}]   ;;  %s2938_s1 = inlined_call_operand.vmem [shape: f32[2,16,256], index: 1, kind: input, shape index: {}]   ;;  %s2939_s2 = inlined_call_operand.vmem [shape: bf16[64,384], index: 2, kind: input, shape index: {}]   ;;  %s2940_s3 = inlined_call_operand.vmem [shape: f32[1,288], index: 3, kind: input, shape index: {}]   ;;  %s2941_s4 = inlined_call_operand.vmem [shape: bf16[32,288], index: 4, kind: input, shape index: {}]   ;;  %s2942_s5 = inlined_call_operand.vmem [shape: f32[32,1], index: 5, kind: input, shape index: {}]   ;;  %s2943_s6 = inlined_call_operand.vmem [shape: bf16[32,288], index: 6, kind: input, shape index: {}]   ;;  %s2944_s7 = inlined_call_operand.vmem [shape: f32[32,1], index: 7, kind: input, shape index: {}]   ;;  %s2945_s8 = inlined_call_operand.vmem [shape: f32[2,32,288], index: 8, kind: output, shape index: {}]  }
   0x1 LB: > { %s2165_s28 = sadd.s32 4294967295, %s2420_s27   ;;  %p2169_p0 = scmp.ge.s32.totalorder %s2420_s27, 1  ;;  %s2420_s27 = sphi %s2494_s27, %s18_s27  }
   0x2   : > { %p272_p1 = scmp.lt.s32.totalorder %s2420_s27, 3 }
   0x4   : > { %p273_p2 = pnand %p2169_p0, %p272_p1 }
   0x5   : > { %v2381_v0 = vld [vmem:[%s2939_s2 + $0x4] ss:$12 sps:$4 sm:$0xff] (!%p273_p2)   ;;  %v2422_v1 = vmov (!%p273_p2), 0.0   ;;  %v2383_v2 = vld [vmem:[%s2939_s2 + $0x8] ss:$12 sps:$4 sm:$0xff] (!%p273_p2)   ;;  %vm2423_vm0 = vmmov (!%p273_p2), 0  }
   0x6   : > { %276 = sbr.rel (%p273_p2) target bundleno = 1246 (0x4de), region = 52  ;;  %2283 = vmatprep.subr.bf16.mxu1 (!%p273_p2), %v2422_v1  ;;  %2291 = vmatprep.mubr.msk.bf16.mxu1 (!%p273_p2), %vm2423_vm0, %v2422_v1  ;;  %v2384_v3 = vld [vmem:[%s2939_s2] ss:$12 sps:$4 sm:$0xff] (!%p273_p2)   ;;  %p2511_p3 = scmp.lt.s32.totalorder (!%p273_p2), %s2165_s28, 1  ;;  %v2385_v4 = vld [vmem:[%s2939_s2 + $0x1c] ss:$12 sps:$4 sm:$0xff] (!%p273_p2)  }
   0x7   : > { %418 = vmatprep.subr.bf16.mxu0 (!%p273_p2), %v2381_v0  ;;  %2284 = vmatpush3.bf16.msra.mxu1 (!%p273_p2), %v2383_v2  ;;  %v2424_v5 = vmov (!%p273_p2), 0   ;;  %v2387_v6 = vld [vmem:[%s2939_s2 + $0x20] ss:$12 sps:$4 sm:$0xff] (!%p273_p2)   ;;  %v2388_v7 = vld [vmem:[%s2939_s2 + $0x18] ss:$12 sps:$4 sm:$0xff] (!%p273_p2)   ;;  %s2425_s20 = smov (!%p273_p2), 31  }
   0x8   : > { %450 = vmatprep.mubr.bf16.mxu0 (!%p273_p2), %v2424_v5  ;;  %508 = vst [vmem:[#allocation2 + $0x18] sm:$0xff] (!%p273_p2), %v2424_v5  ;;  %509 = vst [vmem:[#allocation2 + $0x20] sm:$0xff] (!%p273_p2), %v2424_v5  ;;  %419 = vmatpush1.bf16.msra.mxu0 (!%p273_p2), %v2384_v3  ;;  %v2389_v8 = vld [vmem:[%s2939_s2 + $0x34] ss:$12 sps:$4 sm:$0xff] (!%p273_p2)   ;;  %v2391_v9 = vld [vmem:[%s2939_s2 + $0x38] ss:$12 sps:$4 sm:$0xff] (!%p273_p2)  }
   0x9   : > { %510 = vst [vmem:[#allocation2 + $0x28] sm:$0xff] (!%p273_p2), %v2424_v5  ;;  %1367 = vst [vmem:[#allocation3] sm:$0xff] (!%p273_p2), %v2424_v5  ;;  %2285 = vmatprep.subr.bf16.mxu1 (!%p273_p2), %v2422_v1  ;;  %420 = vmatprep.subr.bf16.mxu0 (!%p273_p2), %v2385_v4  ;;  %v2392_v10 = vld [vmem:[%s2939_s2 + $0x30] ss:$12 sps:$4 sm:$0xff] (!%p273_p2)   ;;  %v2393_v11 = vld [vmem:[%s2939_s2 + $0x4c] ss:$12 sps:$4 sm:$0xff] (!%p273_p2)  }
   0xa   : > { %1369 = vst [vmem:[#allocation3 + $0x10] sm:$0xff] (!%p273_p2), %v2424_v5  ;;  %1370 = vst [vmem:[#allocation3 + $0x18] sm:$0xff] (!%p273_p2), %v2424_v5  ;;  %2379 = vset.pattern.permute.xlu0 (!%p273_p2), %v2424_v5  ;;  %2380 = vset.pattern.permute.xlu1 (!%p273_p2), %v2424_v5  ;;  %v2395_v14 = vld [vmem:[%s2939_s2 + $0x50] ss:$12 sps:$4 sm:$0xff] (!%p273_p2)   ;;  %v2396_v18 = vld [vmem:[%s2939_s2 + $0x48] ss:$12 sps:$4 sm:$0xff] (!%p273_p2)  }
   0xb   : > { %1372 = vst [vmem:[#allocation3 + $0x28] sm:$0xff] (!%p273_p2), %v2424_v5  ;;  %2286 = vmatpush3.bf16.msra.mxu1 (!%p273_p2), %v2387_v6  ;;  %s2426_s21 = smov (!%p273_p2), 19   ;;  %vm414_vm1 = vcmask (!%p273_p2), 523264   ;;  %s2427_s22 = smov (!%p273_p2), 33   ;;  %vm574_vm2 = vcmask (!%p273_p2), 121856   ;;  %vm518_vm3 = vcmask (!%p273_p2), 285848  }
   0xc   : > { %421 = vmatpush1.bf16.msra.mxu0 (!%p273_p2), %v2388_v7  ;;  %2287 = vmatprep.subr.bf16.mxu1 (!%p273_p2), %v2422_v1  ;;  %s2428_s23 = smov (!%p273_p2), 35   ;;  %s2431_s26 = smov (!%p273_p2), 23   ;;  %vm583_vm4 = vcmask (!%p273_p2), 269448   ;;  %vm592_vm5 = vcmask (!%p273_p2), 417048   ;;  %vm527_vm6 = vcmask (!%p273_p2), 433448   ;;  %vm601_vm7 = vcmask (!%p273_p2), 564648  }
   0xd   : > { %s2948_s28 = smov (!%p2511_p3, %s2165_s28), 1  ;;  %422 = vmatprep.subr.bf16.mxu0 %v2389_v8  ;;  %s2432_s29 = smov 39   ;;  %vm536_vm8 = vcmask 581048   ;;  %vm610_vm9 = vcmask 712248   ;;  %vm545_vm10 = vcmask 728648   ;;  %vm619_vm11 = vcmask 859848  }
   0xe   : > { %s2212_s24 = sshll.u32 %s2948_s28, 3  ;;  %s2213_s25 = sshll.u32 %s2948_s28, 5  ;;  %vm639_vm12 = vcmask 105472   ;;  %vm554_vm13 = vcmask 876248   ;;  %vm628_vm14 = vcmask 1007448   ;;  %vm637_vm15 = vcmask 1048552  }
   0xf   : > { %s315_s10 = scalar_lea.vmem %s2937_s0, %s2212_s24  ;;  %s320_s13 = scalar_lea.vmem %s2938_s1, %s2213_s25  ;;  %2288 = vmatpush3.bf16.msra.mxu1 %v2391_v9  ;;  %vm648_vm0 = vcmask 253048   ;;  %v2400_v60 = vld [vmem:[%s2941_s4 + $0x4] ss:$12 sps:$4 sm:$0xff]   ;;  %v1063_v4 = vld [vmem:[%s2942_s5 + $0x8] sm:$0xff]  ;;  %v1065_v7 = vld [vmem:[%s2942_s5 + $0x18] sm:$0xff] }
  0x10   : > { %v565_v12 = vld [vmem:[%s320_s13] sm:$0xff]  ;;  %v566_v13 = vld [vmem:[%s320_s13 + $0x10] sm:$0xff]  ;;  %v585_v16 = vld [vmem:[%s320_s13 + $0x8] sm:$0xff]  ;;  %423 = vmatpush1.bf16.msra.mxu0 %v2392_v10  ;;  %2289 = vmatprep.subr.bf16.mxu1 %v2422_v1  ;;  %s2429_s24 = smov 21   ;;  %s2430_s25 = smov 37  }
  0x11   : > { %v567_v15 = vpack.c.bf16 %v566_v13, %v565_v12  ;;  %v586_v17 = vld [vmem:[%s320_s13 + $0x18] sm:$0xff]  ;;  %424 = vmatprep.subr.bf16.mxu0 %v2393_v11  ;;  %v2397_v19 = vld [vmem:[%s315_s10] sm:$0xff]   ;;  %s2433_s30 = smov 25   ;;  %s2434_s9 = smov 41   ;;  %v1064_v6 = vld [vmem:[%s2942_s5 + $0x10] sm:$0xff] }
  0x12   : > { %v587_v20 = vpack.c.bf16 %v586_v17, %v585_v16  ;;  %s2435_s10 = smov 45   ;;  %s2436_s11 = smov 27   ;;  %v1062_v3 = vld [vmem:[%s2942_s5] sm:$0xff] }
  0x13   : > { %569 = vrot.lane.b32.xlu0 %v567_v15, %s2425_s20  ;;  %515 = vrot.lane.b32.xlu1 %v567_v15, %s2426_s21  ;;  %s2437_s12 = smov 43   ;;  %s2438_s13 = smov 47  }
  0x14   : > { %2290 = vmatpush3.bf16.msra.mxu1 %v2395_v14  ;;  %425 = vmatpush1.bf16.msra.mxu0 %v2396_v18  ;;  %s2439_s14 = smov 29   ;;  %s2440_s15 = smov 49  }
  0x15   : > { %s2441_s16 = smov 127   ;;  %s2442_s17 = smov 126  }
  0x16   : > { %s2443_s18 = smov 110   ;;  %s2444_s19 = smov 109  }
  0x17   : > { %580 = vrot.lane.b32.xlu0 %v567_v15, %s2427_s22  ;;  %2292 = vmatmul.mubr.msk.bf16.vlgmr.msra.gmra.mrb[0].mxu1 %vm414_vm1, %v2397_v19  ;;  %s2445_s20 = smov 108   ;;  %s2446_s22 = smov 92  }
  0x18   : > { %589 = vrot.lane.b32.xlu1 %v587_v20, %s2428_s23  ;;  %2188 = vmatmul.mubr.msk.bf16.vlgmr.msra.gmra.mrb[0].mxu0 %vm414_vm1, %v2397_v19  ;;  %vm563_vm1 = vcmask 1023848   ;;  %s2447_s23 = smov 91  }
  0x19   : > { %1260 = vmatprep.mubr.bf16.mxu1 %v2400_v60  ;;  %1154 = vmatprep.mubr.bf16.mxu0 %v2400_v60 }
  0x1b   : > { %524 = vrot.lane.b32.xlu0 %v567_v15, %s2429_s24 }
  0x1c   : > { %598 = vrot.lane.b32.xlu1 %v587_v20, %s2430_s25 }
  0x1f   : > { %533 = vrot.lane.b32.xlu0 %v567_v15, %s2431_s26  ;;  %s2448_s26 = smov 90  }
  0x20   : > { %607 = vrot.lane.b32.xlu1 %v587_v20, %s2432_s29 }
  0x23   : > { %542 = vrot.lane.b32.xlu0 %v567_v15, %s2433_s30 }
  0x24   : > { %616 = vrot.lane.b32.xlu1 %v587_v20, %s2434_s9 }
  0x27   : > { %634 = vrot.lane.b32.xlu0 %v587_v20, %s2435_s10 }
  0x28   : > { %551 = vrot.lane.b32.xlu1 %v567_v15, %s2436_s11 }
  0x2b   : > { %625 = vrot.lane.b32.xlu0 %v587_v20, %s2437_s12 }
  0x2c   : > { %645 = vrot.lane.b32.xlu1 %v587_v20, %s2438_s13 }
  0x2f   : > { %560 = vrot.lane.b32.xlu0 %v567_v15, %s2439_s14 }
  0x30   : > { %654 = vrot.lane.b32.xlu1 %v587_v20, %s2440_s15 }
  0x85   : > { %v570_v21 = vpop.permute.xlu0 %569  ;;  %v516_v22 = vpop.permute.xlu1 %515 }
  0x86   : > { %575 = vst.msk [vmem:[#allocation2 + $0x20] sm:$0xff] %vm574_vm2, %v570_v21  ;;  %vm572_vm2 = vcmask 1048568  }
  0x87   : > { %519 = vst.msk [vmem:[#allocation2 + $0x18] sm:$0xff] %vm518_vm3, %v516_v22  ;;  %vm657_vm3 = vcmask 400648  }
  0x89   : > { %v581_v23 = vpop.permute.xlu0 %580 }
  0x8a   : > { %584 = vst.msk [vmem:[#allocation2 + $0x20] sm:$0xff] %vm583_vm4, %v581_v23  ;;  %v590_v24 = vpop.permute.xlu1 %589  ;;  %vm667_vm4 = vcmask 261120  }
  0x8b   : > { %593 = vst.msk [vmem:[#allocation2 + $0x20] sm:$0xff] %vm592_vm5, %v590_v24  ;;  %vm696_vm5 = vcmask 1039360  }
  0x8d   : > { %v525_v25 = vpop.permute.xlu0 %524 }
  0x8e   : > { %528 = vst.msk [vmem:[#allocation2 + $0x18] sm:$0xff] %vm527_vm6, %v525_v25  ;;  %v599_v26 = vpop.permute.xlu1 %598  ;;  %vm737_vm6 = vcmask 1031168  }
  0x8f   : > { %602 = vst.msk [vmem:[#allocation2 + $0x20] sm:$0xff] %vm601_vm7, %v599_v26  ;;  %vm778_vm7 = vcmask 900096  }
  0x91   : > { %v534_v27 = vpop.permute.xlu0 %533 }
  0x92   : > { %537 = vst.msk [vmem:[#allocation2 + $0x18] sm:$0xff] %vm536_vm8, %v534_v27  ;;  %v608_v28 = vpop.permute.xlu1 %607  ;;  %vm819_vm8 = vcmask 891904  }
  0x93   : > { %611 = vst.msk [vmem:[#allocation2 + $0x20] sm:$0xff] %vm610_vm9, %v608_v28  ;;  %vm860_vm9 = vcmask 883712  }
  0x95   : > { %v543_v29 = vpop.permute.xlu0 %542 }
  0x96   : > { %546 = vst.msk [vmem:[#allocation2 + $0x18] sm:$0xff] %vm545_vm10, %v543_v29  ;;  %v617_v30 = vpop.permute.xlu1 %616  ;;  %vm901_vm10 = vcmask 752640  }
  0x97   : > { %620 = vst.msk [vmem:[#allocation2 + $0x20] sm:$0xff] %vm619_vm11, %v617_v30  ;;  %vm942_vm11 = vcmask 744448  }
  0x99   : > { %v635_v31 = vpop.permute.xlu0 %634 }
  0x9a   : > { %640 = vst.msk [vmem:[#allocation2 + $0x28] sm:$0xff] %vm639_vm12, %v635_v31  ;;  %v552_v32 = vpop.permute.xlu1 %551  ;;  %vm983_vm12 = vcmask 736256  }
  0x9b   : > { %555 = vst.msk [vmem:[#allocation2 + $0x18] sm:$0xff] %vm554_vm13, %v552_v32  ;;  %vm1397_vm13 = vcmask 154624  }
  0x9d   : > { %v626_v33 = vpop.permute.xlu0 %625 }
  0x9e   : > { %629 = vst.msk [vmem:[#allocation2 + $0x20] sm:$0xff] %vm628_vm14, %v626_v33  ;;  %v646_v34 = vpop.permute.xlu1 %645  ;;  %vm1411_vm14 = vcmask 416768  }
  0x9f   : > { %638 = vst.msk [vmem:[#allocation2 + $0x20] sm:$0xff] %vm637_vm15, %v635_v31  ;;  %vm1408_vm15 = vcmask 1047704  }
  0xa0   : > { %649 = vst.msk [vmem:[#allocation2 + $0x28] sm:$0xff] %vm648_vm0, %v646_v34 }
  0xa1   : > { %v561_v35 = vpop.permute.xlu0 %560 }
  0xa2   : > { %564 = vst.msk [vmem:[#allocation2 + $0x18] sm:$0xff] %vm563_vm1, %v561_v35  ;;  %v655_v36 = vpop.permute.xlu1 %654 }
  0xa3   : > { %573 = vst.msk [vmem:[#allocation2 + $0x18] sm:$0xff] %vm572_vm2, %v570_v21 }
  0xa4   : > { %658 = vst.msk [vmem:[#allocation2 + $0x28] sm:$0xff] %vm657_vm3, %v655_v36 }
  0xa6   : > { %v2565_v37 = vld [vmem:[#allocation2 + $0x20] sm:$0xff] }
  0xaa   : > { %v2567_v38 = vld [vmem:[#allocation2 + $0x18] sm:$0xff] }
  0xab   : > { %v2569_v39 = vld [vmem:[#allocation2 + $0x28] sm:$0xff]  ;;  %690 = vrot.lane.b32.xlu1 %v2567_v38, %s2441_s16 }
  0xac   : > { %671 = vst.msk [vmem:[#allocation4 + $0x28] sm:$0xff] %vm667_vm4, %v2569_v39  ;;  %694 = vrot.lane.b32.xlu0 %v2569_v39, %s2441_s16 }
  0xaf   : > { %731 = vrot.lane.b32.xlu1 %v2567_v38, %s2442_s17 }
  0xb0   : > { %735 = vrot.lane.b32.xlu0 %v2569_v39, %s2442_s17 }
  0xb3   : > { %772 = vrot.lane.b32.xlu1 %v2567_v38, %s2443_s18  ;;  %v1013_v33 = vld [vmem:[#allocation4 + $0x28] sm:$0xff] }
  0xb4   : > { %776 = vrot.lane.b32.xlu0 %v2569_v39, %s2443_s18 }
  0xb7   : > { %692 = vrot.lane.b32.xlu1 %v2565_v37, %s2441_s16 }
  0xbb   : > { %733 = vrot.lane.b32.xlu1 %v2565_v37, %s2442_s17 }
  0xbf   : > { %774 = vrot.lane.b32.xlu1 %v2565_v37, %s2443_s18 }
  0xea   : > { %v495_v40 = vpop.f32.mrb[0].mxu1 }
  0xeb   : > { %v452_v41 = vpop.f32.mrb[0].mxu0  ;;  %v2293_v42 = vpop.f32.mrb[1].mxu1 }
  0xec   : > { %v454_v43 = vpop.f32.mrb[1].mxu0  ;;  %v498_v44 = vpop.f32.mrb[2].mxu1 }
  0xed   : > { %v504_v45 = vpack.c.bf16 %v498_v44, %v495_v40  ;;  %v456_v46 = vpop.f32.mrb[2].mxu0  ;;  %v2294_v47 = vpop.f32.mrb[3].mxu1 }
  0xee   : > { %v2591_v48 = vpack.c.bf16 %v456_v46, %v452_v41  ;;  %v458_v49 = vpop.f32.mrb[3].mxu0 }
  0xef   : > { %668 = vst.msk [vmem:[#allocation4 + $0x10] sm:$0xff] %vm667_vm4, %v504_v45  ;;  %v2594_v50 = vpack.c.bf16 %v458_v49, %v454_v43  ;;  %688 = vrot.lane.b32.xlu1 %v504_v45, %s2441_s16 }
  0xf0   : > { %684 = vrot.lane.b32.xlu0 %v2591_v48, %s2441_s16 }
  0xf1   : > { %1122 = vmatprep.subr.bf16.mxu0 %v2594_v50 }
  0xf2   : > { %1123 = vmatpush1.bf16.msra.mxu0 %v2591_v48 }
  0xf3   : > { %815 = vrot.lane.b32.xlu1 %v2565_v37, %s2444_s19  ;;  %1124 = vmatprep.subr.bf16.mxu0 %v2565_v37 }
  0xf4   : > { %725 = vrot.lane.b32.xlu0 %v2591_v48, %s2442_s17 }
  0xf6   : > { %1125 = vmatpush1.bf16.msra.mxu0 %v2567_v38  ;;  %v1010_v27 = vld [vmem:[#allocation4 + $0x10] sm:$0xff] }
  0xf7   : > { %729 = vrot.lane.b32.xlu1 %v504_v45, %s2442_s17 }
  0xf8   : > { %766 = vrot.lane.b32.xlu0 %v2591_v48, %s2443_s18 }
  0xfb   : > { %770 = vrot.lane.b32.xlu1 %v504_v45, %s2443_s18 }
  0xfc   : > { %807 = vrot.lane.b32.xlu0 %v2591_v48, %s2444_s19 }
  0xff   : > { %811 = vrot.lane.b32.xlu1 %v504_v45, %s2444_s19 }
 0x100   : > { %686 = vrot.lane.b32.xlu0 %v2594_v50, %s2441_s16 }
 0x103   : > { %813 = vrot.lane.b32.xlu1 %v2567_v38, %s2444_s19 }
 0x104   : > { %817 = vrot.lane.b32.xlu0 %v2569_v39, %s2444_s19 }
 0x107   : > { %852 = vrot.lane.b32.xlu1 %v504_v45, %s2445_s20 }
 0x108   : > { %727 = vrot.lane.b32.xlu0 %v2594_v50, %s2442_s17 }
 0x10b   : > { %856 = vrot.lane.b32.xlu1 %v2565_v37, %s2445_s20 }
 0x10c   : > { %848 = vrot.lane.b32.xlu0 %v2591_v48, %s2445_s20 }
 0x10f   : > { %854 = vrot.lane.b32.xlu1 %v2567_v38, %s2445_s20 }
 0x110   : > { %768 = vrot.lane.b32.xlu0 %v2594_v50, %s2443_s18 }
 0x113   : > { %893 = vrot.lane.b32.xlu1 %v504_v45, %s2446_s22 }
 0x114   : > { %858 = vrot.lane.b32.xlu0 %v2569_v39, %s2445_s20 }
 0x117   : > { %897 = vrot.lane.b32.xlu1 %v2565_v37, %s2446_s22 }
 0x118   : > { %809 = vrot.lane.b32.xlu0 %v2594_v50, %s2444_s19 }
 0x11b   : > { %895 = vrot.lane.b32.xlu1 %v2567_v38, %s2446_s22 }
 0x11c   : > { %889 = vrot.lane.b32.xlu0 %v2591_v48, %s2446_s22 }
 0x11d   : > { %v691_v51 = vpop.permute.xlu1 %690 }
 0x11e   : > { %v695_v52 = vpop.permute.xlu0 %694 }
 0x11f   : > { %712 = vst.msk [vmem:[#allocation4 + $0x58] sm:$0xff] %vm667_vm4, %v695_v52  ;;  %934 = vrot.lane.b32.xlu1 %v504_v45, %s2447_s23 }
 0x120   : > { %850 = vrot.lane.b32.xlu0 %v2594_v50, %s2445_s20 }
 0x121   : > { %v732_v53 = vpop.permute.xlu1 %731 }
 0x122   : > { %v736_v54 = vpop.permute.xlu0 %735 }
 0x123   : > { %753 = vst.msk [vmem:[#allocation4 + $0x88] sm:$0xff] %vm667_vm4, %v736_v54  ;;  %938 = vrot.lane.b32.xlu1 %v2565_v37, %s2447_s23 }
 0x124   : > { %899 = vrot.lane.b32.xlu0 %v2569_v39, %s2446_s22 }
 0x125   : > { %v773_v55 = vpop.permute.xlu1 %772 }
 0x126   : > { %v777_v56 = vpop.permute.xlu0 %776 }
 0x127   : > { %794 = vst.msk [vmem:[#allocation4 + $0xb8] sm:$0xff] %vm667_vm4, %v777_v56  ;;  %936 = vrot.lane.b32.xlu1 %v2567_v38, %s2447_s23 }
 0x128   : > { %891 = vrot.lane.b32.xlu0 %v2594_v50, %s2446_s22 }
 0x129   : > { %v693_v57 = vpop.permute.xlu1 %692 }
 0x12a   : > { %v699_v58 = vsel %vm696_vm5, %v691_v51, %v693_v57  ;;  %v700_v59 = vsel %vm696_vm5, %v693_v57, %v695_v52  ;;  %v1019_v52 = vld [vmem:[#allocation4 + $0x58] sm:$0xff] }
 0x12b   : > { %975 = vrot.lane.b32.xlu1 %v504_v45, %s2448_s26 }
 0x12c   : > { %930 = vrot.lane.b32.xlu0 %v2591_v48, %s2447_s23 }
 0x12d   : > { %v734_v61 = vpop.permute.xlu1 %733 }
 0x12e   : > { %v2665_v62 = vsel %vm737_vm6, %v732_v53, %v734_v61  ;;  %v741_v63 = vsel %vm737_vm6, %v734_v61, %v736_v54 }
 0x12f   : > { %979 = vrot.lane.b32.xlu1 %v2565_v37, %s2448_s26 }
 0x130   : > { %932 = vrot.lane.b32.xlu0 %v2594_v50, %s2447_s23 }
 0x131   : > { %v775_v0 = vpop.permute.xlu1 %774 }
 0x132   : > { %v2673_v1 = vsel %vm778_vm7, %v773_v55, %v775_v0  ;;  %v2676_v2 = vsel %vm778_vm7, %v775_v0, %v777_v56 }
 0x133   : > { %977 = vrot.lane.b32.xlu1 %v2567_v38, %s2448_s26 }
 0x134   : > { %940 = vrot.lane.b32.xlu0 %v2569_v39, %s2447_s23 }
 0x137   : > { %1073 = vperm.xlu1 %2380, %v1063_v4  }
 0x138   : > { %971 = vrot.lane.b32.xlu0 %v2591_v48, %s2448_s26 }
 0x13b   : > { %1078 = vperm.xlu1 %2380, %v1064_v6  }
 0x13c   : > { %973 = vrot.lane.b32.xlu0 %v2594_v50, %s2448_s26 }
 0x140   : > { %981 = vrot.lane.b32.xlu0 %v2569_v39, %s2448_s26 }
 0x144   : > { %1068 = vperm.xlu0 %2379, %v1062_v3  }
 0x148   : > { %1083 = vperm.xlu0 %2379, %v1065_v7   ;;  %v1025_v7 = vld [vmem:[#allocation4 + $0x88] sm:$0xff] }
 0x161   : > { %v689_v8 = vpop.permute.xlu1 %688 }
 0x162   : > { %709 = vst.msk [vmem:[#allocation4 + $0x40] sm:$0xff] %vm667_vm4, %v689_v8  ;;  %v685_v9 = vpop.permute.xlu0 %684 }
 0x165   : > { %v816_v10 = vpop.permute.xlu1 %815 }
 0x166   : > { %v726_v11 = vpop.permute.xlu0 %725 }
 0x169   : > { %v730_v12 = vpop.permute.xlu1 %729  ;;  %v1016_v40 = vld [vmem:[#allocation4 + $0x40] sm:$0xff] }
 0x16a   : > { %750 = vst.msk [vmem:[#allocation4 + $0x70] sm:$0xff] %vm667_vm4, %v730_v12  ;;  %v767_v13 = vpop.permute.xlu0 %766 }
 0x16d   : > { %v771_v14 = vpop.permute.xlu1 %770 }
 0x16e   : > { %791 = vst.msk [vmem:[#allocation4 + $0xa0] sm:$0xff] %vm667_vm4, %v771_v14  ;;  %v808_v15 = vpop.permute.xlu0 %807 }
 0x171   : > { %v812_v16 = vpop.permute.xlu1 %811 }
 0x172   : > { %832 = vst.msk [vmem:[#allocation4 + $0xd0] sm:$0xff] %vm667_vm4, %v812_v16  ;;  %v687_v17 = vpop.permute.xlu0 %686 }
 0x173   : > { %v697_v18 = vsel %vm696_vm5, %v685_v9, %v687_v17  ;;  %v698_v19 = vsel %vm696_vm5, %v687_v17, %v689_v8 }
 0x174   : > { %1126 = vmatprep.subr.bf16.mxu0 %v698_v19  ;;  %v2401_v19 = vld [vmem:[%s2941_s4 + $0x1c] ss:$12 sps:$4 sm:$0xff]  }
 0x175   : > { %v814_v20 = vpop.permute.xlu1 %813  ;;  %1127 = vmatpush1.bf16.msra.mxu0 %v697_v18  ;;  %v2398_v18 = vld [vmem:[%s2941_s4] ss:$12 sps:$4 sm:$0xff]  }
 0x176   : > { %v822_v21 = vsel %vm819_vm8, %v814_v20, %v816_v10  ;;  %v818_v22 = vpop.permute.xlu0 %817  ;;  %1128 = vmatprep.subr.bf16.mxu0 %v700_v59 }
 0x177   : > { %v823_v23 = vsel %vm819_vm8, %v816_v10, %v818_v22  ;;  %835 = vst.msk [vmem:[#allocation4 + $0xe8] sm:$0xff] %vm667_vm4, %v818_v22 }
 0x179   : > { %v853_v24 = vpop.permute.xlu1 %852  ;;  %v1034_v25 = vld [vmem:[#allocation4 + $0xd0] sm:$0xff]  ;;  %1129 = vmatpush1.bf16.msra.mxu0 %v699_v58 }
 0x17a   : > { %873 = vst.msk [vmem:[#allocation4 + $0x100] sm:$0xff] %vm667_vm4, %v853_v24  ;;  %2219 = vmatprep.subr.bf16.mxu1 %v1034_v25  ;;  %v728_v26 = vpop.permute.xlu0 %727  ;;  %v1022_v58 = vld [vmem:[#allocation4 + $0x70] sm:$0xff]  ;;  %v1031_v25 = vld [vmem:[#allocation4 + $0xb8] sm:$0xff] }
 0x17b   : > { %v738_v28 = vsel %vm737_vm6, %v726_v11, %v728_v26  ;;  %v739_v29 = vsel %vm737_vm6, %v728_v26, %v730_v12  ;;  %2220 = vmatpush3.bf16.msra.mxu1 %v1010_v27  ;;  %v2403_v27 = vld [vmem:[%s2941_s4 + $0x18] ss:$12 sps:$4 sm:$0xff]  }
 0x17c   : > { %1130 = vmatprep.subr.bf16.mxu0 %v739_v29 }
 0x17d   : > { %v857_v30 = vpop.permute.xlu1 %856  ;;  %1131 = vmatpush1.bf16.msra.mxu0 %v738_v28 }
 0x17e   : > { %v849_v31 = vpop.permute.xlu0 %848  ;;  %v1037_v32 = vld [vmem:[#allocation4 + $0xe8] sm:$0xff]  ;;  %1132 = vmatprep.subr.bf16.mxu0 %v741_v63 }
 0x17f   : > { %2221 = vmatprep.subr.bf16.mxu1 %v1037_v32  ;;  %v2405_v32 = vld [vmem:[%s2941_s4 + $0x20] ss:$12 sps:$4 sm:$0xff]  }
 0x180   : > { %2222 = vmatpush3.bf16.msra.mxu1 %v1013_v33 }
 0x181   : > { %v855_v34 = vpop.permute.xlu1 %854  ;;  %v1040_v35 = vld [vmem:[#allocation4 + $0x100] sm:$0xff]  ;;  %1133 = vmatpush1.bf16.msra.mxu0 %v2665_v62 }
 0x182   : > { %v863_v36 = vsel %vm860_vm9, %v855_v34, %v857_v30  ;;  %2223 = vmatprep.subr.bf16.mxu1 %v1040_v35  ;;  %v769_v37 = vpop.permute.xlu0 %768  ;;  %v1340_v35 = vlaneseq }
 0x183   : > { %v779_v38 = vsel %vm778_vm7, %v767_v13, %v769_v37  ;;  %v780_v39 = vsel %vm778_vm7, %v769_v37, %v771_v14  ;;  %v1028_v13 = vld [vmem:[#allocation4 + $0xa0] sm:$0xff] }
 0x184   : > { %2224 = vmatpush3.bf16.msra.mxu1 %v1016_v40  ;;  %1134 = vmatprep.subr.bf16.mxu0 %v780_v39  ;;  %v1341_v40 = vshrl.u32 %v1340_v35, 7 }
 0x185   : > { %v894_v41 = vpop.permute.xlu1 %893  ;;  %1135 = vmatpush1.bf16.msra.mxu0 %v779_v38 }
 0x186   : > { %914 = vst.msk [vmem:[#allocation4 + $0x130] sm:$0xff] %vm667_vm4, %v894_v41  ;;  %v859_v42 = vpop.permute.xlu0 %858  ;;  %1136 = vmatprep.subr.bf16.mxu0 %v2676_v2 }
 0x187   : > { %v864_v43 = vsel %vm860_vm9, %v857_v30, %v859_v42  ;;  %876 = vst.msk [vmem:[#allocation4 + $0x118] sm:$0xff] %vm667_vm4, %v859_v42  ;;  %v2404_v30 = vld [vmem:[%s2941_s4 + $0x8] ss:$12 sps:$4 sm:$0xff]  }
 0x189   : > { %v898_v44 = vpop.permute.xlu1 %897  ;;  %1137 = vmatpush1.bf16.msra.mxu0 %v2673_v1 }
 0x18a   : > { %v810_v45 = vpop.permute.xlu0 %809 }
 0x18b   : > { %v820_v46 = vsel %vm819_vm8, %v808_v15, %v810_v45  ;;  %v821_v47 = vsel %vm819_vm8, %v810_v45, %v812_v16  ;;  %v1342_v45 = vsub.s32 0, %v1341_v40 }
 0x18c   : > { %1138 = vmatprep.subr.bf16.mxu0 %v821_v47 }
 0x18d   : > { %v896_v48 = vpop.permute.xlu1 %895  ;;  %1139 = vmatpush1.bf16.msra.mxu0 %v820_v46  ;;  %v1046_v53 = vld [vmem:[#allocation4 + $0x130] sm:$0xff] }
 0x18e   : > { %v904_v49 = vsel %vm901_vm10, %v896_v48, %v898_v44  ;;  %v890_v50 = vpop.permute.xlu0 %889  ;;  %v1043_v51 = vld [vmem:[#allocation4 + $0x118] sm:$0xff]  ;;  %1140 = vmatprep.subr.bf16.mxu0 %v823_v23  ;;  %v1338_v48 = vld [vmem:[%s2940_s3] sm:$0x7] }
 0x18f   : > { %2225 = vmatprep.subr.bf16.mxu1 %v1043_v51 }
 0x190   : > { %2226 = vmatpush3.bf16.msra.mxu1 %v1019_v52 }
 0x191   : > { %v935_v54 = vpop.permute.xlu1 %934  ;;  %2227 = vmatprep.subr.bf16.mxu1 %v1046_v53  ;;  %1141 = vmatpush1.bf16.msra.mxu0 %v822_v21 }
 0x192   : > { %955 = vst.msk [vmem:[#allocation4 + $0x160] sm:$0xff] %vm667_vm4, %v935_v54  ;;  %v851_v55 = vpop.permute.xlu0 %850 }
 0x193   : > { %v861_v56 = vsel %vm860_vm9, %v849_v31, %v851_v55  ;;  %v862_v57 = vsel %vm860_vm9, %v851_v55, %v853_v24 }
 0x194   : > { %2228 = vmatpush3.bf16.msra.mxu1 %v1022_v58  ;;  %1142 = vmatprep.subr.bf16.mxu0 %v862_v57 }
 0x195   : > { %v939_v59 = vpop.permute.xlu1 %938  ;;  %1143 = vmatpush1.bf16.msra.mxu0 %v861_v56  ;;  %v1350_v56 = vsub.s32 2, %v1341_v40 }
 0x196   : > { %v900_v60 = vpop.permute.xlu0 %899  ;;  %1144 = vmatprep.subr.bf16.mxu0 %v864_v43 }
 0x197   : > { %v905_v61 = vsel %vm901_vm10, %v898_v44, %v900_v60  ;;  %917 = vst.msk [vmem:[#allocation4 + $0x148] sm:$0xff] %vm667_vm4, %v900_v60  ;;  %v1343_v60 = vrot.slane %v1338_v48, %v1342_v45 }
 0x199   : > { %v937_v62 = vpop.permute.xlu1 %936  ;;  %1145 = vmatpush1.bf16.msra.mxu0 %v863_v36  ;;  %v1052_v8 = vld [vmem:[#allocation4 + $0x160] sm:$0xff] }
 0x19a   : > { %v945_v63 = vsel %vm942_vm11, %v937_v62, %v939_v59  ;;  %v892_v0 = vpop.permute.xlu0 %891 }
 0x19b   : > { %v902_v1 = vsel %vm901_vm10, %v890_v50, %v892_v0  ;;  %v903_v2 = vsel %vm901_vm10, %v892_v0, %v894_v41  ;;  %v1346_v50 = vsub.s32 1, %v1341_v40 }
 0x19c   : > { %1146 = vmatprep.subr.bf16.mxu0 %v903_v2 }
 0x19d   : > { %v976_v3 = vpop.permute.xlu1 %975  ;;  %1147 = vmatpush1.bf16.msra.mxu0 %v902_v1  ;;  %v1347_v1 = vrot.slane %v1338_v48, %v1346_v50 }
 0x19e   : > { %996 = vst.msk [vmem:[#allocation4 + $0x190] sm:$0xff] %vm667_vm4, %v976_v3  ;;  %v931_v4 = vpop.permute.xlu0 %930  ;;  %v1049_v6 = vld [vmem:[#allocation4 + $0x148] sm:$0xff]  ;;  %1148 = vmatprep.subr.bf16.mxu0 %v905_v61 }
 0x19f   : > { %2229 = vmatprep.subr.bf16.mxu1 %v1049_v6 }
 0x1a0   : > { %2230 = vmatpush3.bf16.msra.mxu1 %v1025_v7  ;;  %v1351_v7 = vrot.slane %v1338_v48, %v1350_v56 }
 0x1a1   : > { %v980_v9 = vpop.permute.xlu1 %979  ;;  %2231 = vmatprep.subr.bf16.mxu1 %v1052_v8  ;;  %1149 = vmatpush1.bf16.msra.mxu0 %v904_v49 }
 0x1a2   : > { %v933_v10 = vpop.permute.xlu0 %932 }
 0x1a3   : > { %v943_v11 = vsel %vm942_vm11, %v931_v4, %v933_v10  ;;  %v944_v12 = vsel %vm942_vm11, %v933_v10, %v935_v54 }
 0x1a4   : > { %2232 = vmatpush3.bf16.msra.mxu1 %v1028_v13  ;;  %1150 = vmatprep.subr.bf16.mxu0 %v944_v12 }
 0x1a5   : > { %v978_v14 = vpop.permute.xlu1 %977  ;;  %1151 = vmatpush1.bf16.msra.mxu0 %v943_v11  ;;  %v1058_v26 = vld [vmem:[#allocation4 + $0x190] sm:$0xff] }
 0x1a6   : > { %v986_v15 = vsel %vm983_vm12, %v978_v14, %v980_v9  ;;  %v941_v16 = vpop.permute.xlu0 %940 }
 0x1a7   : > { %v946_v17 = vsel %vm942_vm11, %v939_v59, %v941_v16  ;;  %958 = vst.msk [vmem:[#allocation4 + $0x178] sm:$0xff] %vm667_vm4, %v941_v16 }
 0x1a8   : > { %1152 = vmatprep.subr.bf16.mxu0 %v946_v17 }
 0x1a9   : > { %1153 = vmatpush1.bf16.msra.mxu0 %v945_v63 }
 0x1aa   : > { %v972_v20 = vpop.permute.xlu0 %971 }
 0x1ac   : > { %1155 = vmatmul.mubr.bf16.vlgmr.msra.gmra.mrb[4].mxu0 %v2398_v18 }
 0x1ad   : > { %1164 = vmatprep.mubr.bf16.mxu0 %v2401_v19 }
 0x1ae   : > { %v974_v21 = vpop.permute.xlu0 %973  ;;  %v1055_v22 = vld [vmem:[#allocation4 + $0x178] sm:$0xff] }
 0x1af   : > { %v984_v23 = vsel %vm983_vm12, %v972_v20, %v974_v21  ;;  %v985_v24 = vsel %vm983_vm12, %v974_v21, %v976_v3  ;;  %2233 = vmatprep.subr.bf16.mxu1 %v1055_v22 }
 0x1b0   : > { %2234 = vmatpush3.bf16.msra.mxu1 %v1031_v25  ;;  %1175 = vmatprep.subr.bf16.mxu0 %v985_v24 }
 0x1b1   : > { %2295 = vmatprep.subr.bf16.mxu1 %v1058_v26  ;;  %1176 = vmatpush1.bf16.msra.mxu0 %v984_v23 }
 0x1b2   : > { %v982_v28 = vpop.permute.xlu0 %981 }
 0x1b3   : > { %v987_v29 = vsel %vm983_vm12, %v980_v9, %v982_v28  ;;  %999 = vst.msk [vmem:[#allocation4 + $0x1a8] sm:$0xff] %vm667_vm4, %v982_v28  ;;  %1261 = vmatmul.mubr.bf16.vlgmr.msra.gmra.mrb[4].mxu1 %v2398_v18 }
 0x1b4   : > { %2296 = vmatpush3.bf16.msra.mxu1 %v1058_v26  ;;  %1268 = vmatprep.mubr.bf16.mxu1 %v2401_v19 }
 0x1b5   : > { %1165 = vmatmul.mubr.bf16.gmra.mrb[8].mxu0 %v2403_v27  ;;  %1177 = vmatprep.subr.bf16.mxu0 %v987_v29 }
 0x1b6   : > { %1178 = vmatpush1.bf16.msra.mxu0 %v986_v15  ;;  %1207 = vmatprep.mubr.bf16.mxu0 %v2424_v5  ;;  %v1074_v41 = vpop.permute.xlu1 %1073 }
 0x1ba   : > { %v1061_v31 = vld [vmem:[#allocation4 + $0x1a8] sm:$0xff]  ;;  %v1079_v54 = vpop.permute.xlu1 %1078 }
 0x1bb   : > { %1269 = vmatmul.mubr.bf16.gmra.mrb[8].mxu1 %v2403_v27  ;;  %2297 = vmatprep.subr.bf16.mxu1 %v1061_v31 }
 0x1bc   : > { %2298 = vmatpush3.bf16.msra.mxu1 %v1061_v31  ;;  %2299 = vmatprep.mubr.msk.bf16.mxu1 %vm667_vm4, %v2404_v30 }
 0x1bd   : > { %2196 = vmatmul.mubr.msk.bf16.vlgmr.msra.gmra.mrb[4].mxu0 %vm667_vm4, %v2404_v30 }
 0x1be   : > { %1217 = vmatprep.mubr.bf16.mxu0 %v2424_v5 }
 0x1c3   : > { %2300 = vmatmul.mubr.msk.bf16.vlgmr.msra.gmra.mrb[12].mxu1 %vm667_vm4, %v2405_v32  ;;  %v1069_v43 = vpop.permute.xlu0 %1068 }
 0x1c5   : > { %2197 = vmatmul.mubr.msk.bf16.gmra.mrb[8].mxu0 %vm667_vm4, %v2405_v32 }
 0x1c7   : > { %v1084_v63 = vpop.permute.xlu0 %1083 }
 0x286   : > { %v2235_v33 = vpop.f32.mrb[4].mxu1 }
 0x287   : > { %v2236_v34 = vpop.f32.mrb[5].mxu1 }
 0x288   : > { %v2237_v36 = vadd.f32 %v2236_v34, %v2235_v33  ;;  %v2238_v37 = vpop.f32.mrb[6].mxu1 }
 0x289   : > { %v2239_v38 = vpop.f32.mrb[7].mxu1 }
 0x28a   : > { %v2240_v39 = vadd.f32 %v2239_v38, %v2238_v37  ;;  %v1263_v8 = vadd.f32 %v2237_v36, %v1069_v43 }
 0x28c   : > { %v1266_v18 = vadd.f32 %v2240_v39, %v1074_v41 }
 0x28e   : > { %v2241_v42 = vpop.f32.mrb[8].mxu1 }
 0x28f   : > { %v2242_v44 = vpop.f32.mrb[9].mxu1 }
 0x290   : > { %v2243_v46 = vadd.f32 %v2242_v44, %v2241_v42  ;;  %v2244_v47 = vpop.f32.mrb[10].mxu1  ;;  %v1209_v49 = vpop.f32.mrb[4].mxu0 }
 0x291   : > { %v2245_v51 = vpop.f32.mrb[11].mxu1  ;;  %v2311_v52 = vadd.f32 %v1209_v49, %v1069_v43  ;;  %v1211_v53 = vpop.f32.mrb[5].mxu0 }
 0x292   : > { %v2246_v55 = vadd.f32 %v2245_v51, %v2244_v47  ;;  %v2312_v57 = vadd.f32 %v1211_v53, %v1069_v43  ;;  %v1213_v58 = vpop.f32.mrb[6].mxu0  ;;  %v1271_v3 = vadd.f32 %v2243_v46, %v1079_v54 }
 0x293   : > { %v1326_v59 = vmax.f32 %v2311_v52, 0.0  ;;  %v2313_v61 = vadd.f32 %v1213_v58, %v1074_v41  ;;  %v1215_v62 = vpop.f32.mrb[7].mxu0 }
 0x294   : > { %v1327_v0 = vmax.f32 %v2312_v57, 0.0  ;;  %v2314_v2 = vadd.f32 %v1215_v62, %v1074_v41  ;;  %v1274_v13 = vadd.f32 %v2246_v55, %v1084_v63 }
 0x295   : > { %v1329_v4 = vmax.f32 %v2313_v61, 0.0  ;;  %v1355_v11 = vmul.f32 %v1343_v60, %v1326_v59 }
 0x296   : > { %v2301_v6 = vpop.f32.mrb[12].mxu1  ;;  %v1330_v9 = vmax.f32 %v2314_v2, 0.0  ;;  %v1356_v16 = vmul.f32 %v1347_v1, %v1327_v0 }
 0x297   : > { %v1320_v10 = vadd.f32 %v2301_v6, %v1271_v3  ;;  %v1311_v12 = vpop.f32.mrb[13].mxu1  ;;  %v1358_v14 = vmul.f32 %v1343_v60, %v1329_v4  ;;  %v2408_v3 = vld [vmem:[%s2943_s6 + $0x4] ss:$12 sps:$4 sm:$0xff]   ;;  %v1811_v4 = vld [vmem:[%s2944_s7 + $0x8] sm:$0xff] }
 0x298   : > { %v1312_v15 = vadd.f32 %v1311_v12, %v1263_v8  ;;  %v2302_v17 = vpop.f32.mrb[14].mxu1  ;;  %v1359_v19 = vmul.f32 %v1347_v1, %v1330_v9  ;;  %v1219_v20 = vpop.f32.mrb[8].mxu0  ;;  %2008 = vmatprep.mubr.bf16.mxu0 %v2408_v3  ;;  %1902 = vmatprep.mubr.bf16.mxu1 %v2408_v3  ;;  %v1810_v6 = vld [vmem:[%s2944_s7] sm:$0xff]  ;;  %v1812_v8 = vld [vmem:[%s2944_s7 + $0x10] sm:$0xff] }
 0x299   : > { %v1334_v21 = vmax.f32 %v1320_v10, 0.0  ;;  %v1323_v22 = vadd.f32 %v2302_v17, %v1274_v13  ;;  %v1314_v23 = vpop.f32.mrb[15].mxu1  ;;  %v2315_v24 = vadd.f32 %v1219_v20, %v1079_v54  ;;  %v1221_v25 = vpop.f32.mrb[9].mxu0  ;;  %v1373_v26 = vpack.c.bf16 %v1358_v14, %v1355_v11 }
 0x29a   : > { %v1328_v27 = vmax.f32 %v1312_v15, 0.0  ;;  %v1315_v28 = vadd.f32 %v1314_v23, %v1266_v18  ;;  %v2316_v29 = vadd.f32 %v1221_v25, %v1079_v54  ;;  %v1223_v30 = vpop.f32.mrb[10].mxu0  ;;  %v1374_v31 = vpack.c.bf16 %v1359_v19, %v1356_v16 }
 0x29b   : > { %v1337_v32 = vmax.f32 %v1323_v22, 0.0  ;;  %v1332_v33 = vmax.f32 %v2315_v24, 0.0  ;;  %v2317_v34 = vadd.f32 %v1223_v30, %v1084_v63  ;;  %v1225_v35 = vpop.f32.mrb[11].mxu0  ;;  %v1363_v39 = vmul.f32 %v1351_v7, %v1334_v21 }
 0x29c   : > { %v1331_v36 = vmax.f32 %v1315_v28, 0.0  ;;  %v1333_v37 = vmax.f32 %v2316_v29, 0.0  ;;  %v2318_v38 = vadd.f32 %v1225_v35, %v1084_v63  ;;  %1387 = vrot.lane.b32.xlu0 %v1374_v31, %s2426_s21  ;;  %v1357_v42 = vmul.f32 %v1351_v7, %v1328_v27 }
 0x29d   : > { %v1366_v40 = vmul.f32 %v1351_v7, %v1337_v32  ;;  %v1335_v41 = vmax.f32 %v2317_v34, 0.0  ;;  %v1361_v45 = vmul.f32 %v1343_v60, %v1332_v33 }
 0x29e   : > { %v1360_v43 = vmul.f32 %v1351_v7, %v1331_v36  ;;  %v1336_v44 = vmax.f32 %v2318_v38, 0.0  ;;  %v1362_v48 = vmul.f32 %v1347_v1, %v1333_v37  ;;  %v1813_v7 = vld [vmem:[%s2944_s7 + $0x18] sm:$0xff] }
 0x29f   : > { %v1364_v46 = vmul.f32 %v1343_v60, %v1335_v41  ;;  %v1378_v47 = vpack.c.bf16 %v1366_v40, %v1363_v39 }
 0x2a0   : > { %v1375_v49 = vpack.c.bf16 %v1360_v43, %v1357_v42  ;;  %v1365_v50 = vmul.f32 %v1347_v1, %v1336_v44 }
 0x2a1   : > { %v1376_v51 = vpack.c.bf16 %v1364_v46, %v1361_v45 }
 0x2a2   : > { %1389 = vrot.lane.b32.xlu1 %v1375_v49, %s2426_s21  ;;  %v1377_v52 = vpack.c.bf16 %v1365_v50, %v1362_v48 }
 0x2a3   : > { %1391 = vrot.lane.b32.xlu0 %v1376_v51, %s2426_s21 }
 0x2a6   : > { %1385 = vrot.lane.b32.xlu1 %v1373_v26, %s2426_s21 }
 0x2a7   : > { %1395 = vrot.lane.b32.xlu0 %v1378_v47, %s2426_s21 }
 0x2aa   : > { %1393 = vrot.lane.b32.xlu1 %v1377_v52, %s2426_s21  ;;  %s2343_s21 = smul.u32 96, %s2948_s28 }
 0x30e   : > { %v1388_v53 = vpop.permute.xlu0 %1387 }
 0x314   : > { %v1390_v54 = vpop.permute.xlu1 %1389 }
 0x315   : > { %v1399_v55 = vsel %vm1397_vm13, %v1388_v53, %v1390_v54  ;;  %v1392_v56 = vpop.permute.xlu0 %1391 }
 0x316   : > { %1412 = vst.msk [vmem:[#allocation3 + $0x10] sm:$0xff] %vm1411_vm14, %v1399_v55 }
 0x317   : > { %1413 = vst.msk [vmem:[#allocation3 + $0x18] sm:$0xff] %vm1408_vm15, %v1392_v56 }
 0x318   : > { %v1386_v57 = vpop.permute.xlu1 %1385 }
 0x319   : > { %v1398_v58 = vsel %vm1397_vm13, %v1386_v57, %v1388_v53  ;;  %1409 = vst.msk [vmem:[#allocation3] sm:$0xff] %vm1408_vm15, %v1386_v57  ;;  %v1396_v60 = vpop.permute.xlu0 %1395 }
 0x31a   : > { %1870 = vmatprep.subr.bf16.mxu1 %v1398_v58 }
 0x31c   : > { %v1394_v59 = vpop.permute.xlu1 %1393 }
 0x31d   : > { %v1418_v61 = vld [vmem:[#allocation3 + $0x10] sm:$0xff]  ;;  %v1400_v63 = vsel %vm1397_vm13, %v1392_v56, %v1394_v59  ;;  %v1401_v0 = vsel %vm1397_vm13, %v1394_v59, %v1396_v60 }
 0x31e   : > { %v1419_v62 = vld [vmem:[#allocation3 + $0x18] sm:$0xff]  ;;  %1424 = vst.msk [vmem:[#allocation5 + $0x10] sm:$0xff] %vm667_vm4, %v1418_v61  ;;  %1444 = vrot.lane.b32.xlu0 %v1418_v61, %s2441_s16 }
 0x31f   : > { %1415 = vst.msk [vmem:[#allocation3 + $0x28] sm:$0xff] %vm1411_vm14, %v1401_v0 }
 0x320   : > { %v1416_v1 = vld [vmem:[#allocation3] sm:$0xff] }
 0x321   : > { %1440 = vrot.lane.b32.xlu1 %v1416_v1, %s2441_s16  ;;  %1871 = vmatpush1.bf16.msra.mxu1 %v1416_v1 }
 0x322   : > { %1484 = vrot.lane.b32.xlu0 %v1418_v61, %s2442_s17  ;;  %1872 = vmatprep.subr.bf16.mxu1 %v1400_v63 }
 0x325   : > { %1480 = vrot.lane.b32.xlu1 %v1416_v1, %s2442_s17  ;;  %1873 = vmatpush1.bf16.msra.mxu1 %v1419_v62  ;;  %v1758_v23 = vld [vmem:[#allocation5 + $0x10] sm:$0xff] }
 0x326   : > { %v1421_v2 = vld [vmem:[#allocation3 + $0x28] sm:$0xff]  ;;  %1524 = vrot.lane.b32.xlu0 %v1418_v61, %s2443_s18 }
 0x327   : > { %1427 = vst.msk [vmem:[#allocation5 + $0x28] sm:$0xff] %vm667_vm4, %v1421_v2 }
 0x329   : > { %1520 = vrot.lane.b32.xlu1 %v1416_v1, %s2443_s18 }
 0x32a   : > { %1564 = vrot.lane.b32.xlu0 %v1418_v61, %s2444_s19 }
 0x32d   : > { %1560 = vrot.lane.b32.xlu1 %v1416_v1, %s2444_s19 }
 0x32e   : > { %1446 = vrot.lane.b32.xlu0 %v1419_v62, %s2441_s16 }
 0x331   : > { %1442 = vrot.lane.b32.xlu1 %v1398_v58, %s2441_s16 }
 0x332   : > { %1486 = vrot.lane.b32.xlu0 %v1419_v62, %s2442_s17 }
 0x335   : > { %1482 = vrot.lane.b32.xlu1 %v1398_v58, %s2442_s17 }
 0x336   : > { %1526 = vrot.lane.b32.xlu0 %v1419_v62, %s2443_s18 }
 0x339   : > { %1522 = vrot.lane.b32.xlu1 %v1398_v58, %s2443_s18 }
 0x33a   : > { %1448 = vrot.lane.b32.xlu0 %v1400_v63, %s2441_s16 }
 0x33d   : > { %1562 = vrot.lane.b32.xlu1 %v1398_v58, %s2444_s19 }
 0x33e   : > { %1566 = vrot.lane.b32.xlu0 %v1419_v62, %s2444_s19 }
 0x341   : > { %1450 = vrot.lane.b32.xlu1 %v1421_v2, %s2441_s16 }
 0x342   : > { %1488 = vrot.lane.b32.xlu0 %v1400_v63, %s2442_s17 }
 0x345   : > { %1602 = vrot.lane.b32.xlu1 %v1398_v58, %s2445_s20 }
 0x346   : > { %1604 = vrot.lane.b32.xlu0 %v1418_v61, %s2445_s20 }
 0x349   : > { %1490 = vrot.lane.b32.xlu1 %v1421_v2, %s2442_s17 }
 0x34a   : > { %1528 = vrot.lane.b32.xlu0 %v1400_v63, %s2443_s18 }
 0x34d   : > { %1600 = vrot.lane.b32.xlu1 %v1416_v1, %s2445_s20 }
 0x34e   : > { %1606 = vrot.lane.b32.xlu0 %v1419_v62, %s2445_s20 }
 0x351   : > { %1530 = vrot.lane.b32.xlu1 %v1421_v2, %s2443_s18  ;;  %s2916_s18 = scalar_lea.vmem %s2945_s8, %s2343_s21 }
 0x352   : > { %1568 = vrot.lane.b32.xlu0 %v1400_v63, %s2444_s19 }
 0x355   : > { %1642 = vrot.lane.b32.xlu1 %v1398_v58, %s2446_s22 }
 0x356   : > { %1644 = vrot.lane.b32.xlu0 %v1418_v61, %s2446_s22 }
 0x359   : > { %1570 = vrot.lane.b32.xlu1 %v1421_v2, %s2444_s19 }
 0x35a   : > { %1608 = vrot.lane.b32.xlu0 %v1400_v63, %s2445_s20 }
 0x35d   : > { %1640 = vrot.lane.b32.xlu1 %v1416_v1, %s2446_s22 }
 0x35e   : > { %1646 = vrot.lane.b32.xlu0 %v1419_v62, %s2446_s22 }
 0x361   : > { %1610 = vrot.lane.b32.xlu1 %v1421_v2, %s2445_s20 }
 0x362   : > { %1648 = vrot.lane.b32.xlu0 %v1400_v63, %s2446_s22 }
 0x365   : > { %1682 = vrot.lane.b32.xlu1 %v1398_v58, %s2447_s23 }
 0x366   : > { %1684 = vrot.lane.b32.xlu0 %v1418_v61, %s2447_s23 }
 0x369   : > { %1650 = vrot.lane.b32.xlu1 %v1421_v2, %s2446_s22 }
 0x36a   : > { %1688 = vrot.lane.b32.xlu0 %v1400_v63, %s2447_s23 }
 0x36d   : > { %1680 = vrot.lane.b32.xlu1 %v1416_v1, %s2447_s23 }
 0x36e   : > { %1686 = vrot.lane.b32.xlu0 %v1419_v62, %s2447_s23 }
 0x371   : > { %1690 = vrot.lane.b32.xlu1 %v1421_v2, %s2447_s23 }
 0x372   : > { %1724 = vrot.lane.b32.xlu0 %v1418_v61, %s2448_s26 }
 0x375   : > { %1722 = vrot.lane.b32.xlu1 %v1398_v58, %s2448_s26 }
 0x376   : > { %1728 = vrot.lane.b32.xlu0 %v1400_v63, %s2448_s26 }
 0x379   : > { %1720 = vrot.lane.b32.xlu1 %v1416_v1, %s2448_s26 }
 0x37a   : > { %1726 = vrot.lane.b32.xlu0 %v1419_v62, %s2448_s26 }
 0x37d   : > { %1730 = vrot.lane.b32.xlu1 %v1421_v2, %s2448_s26 }
 0x37e   : > { %1821 = vperm.xlu0 %2379, %v1811_v4  }
 0x381   : > { %1816 = vperm.xlu1 %2380, %v1810_v6   ;;  %v1761_v6 = vld [vmem:[#allocation5 + $0x28] sm:$0xff] }
 0x382   : > { %1831 = vperm.xlu0 %2379, %v1813_v7  }
 0x385   : > { %1826 = vperm.xlu1 %2380, %v1812_v8  }
 0x390   : > { %v1445_v9 = vpop.permute.xlu0 %1444 }
 0x391   : > { %1464 = vst.msk [vmem:[#allocation5 + $0x40] sm:$0xff] %vm667_vm4, %v1445_v9 }
 0x393   : > { %v1441_v10 = vpop.permute.xlu1 %1440 }
 0x394   : > { %v1485_v11 = vpop.permute.xlu0 %1484 }
 0x395   : > { %1504 = vst.msk [vmem:[#allocation5 + $0x70] sm:$0xff] %vm667_vm4, %v1485_v11 }
 0x397   : > { %v1481_v12 = vpop.permute.xlu1 %1480 }
 0x398   : > { %v1525_v13 = vpop.permute.xlu0 %1524 }
 0x399   : > { %1544 = vst.msk [vmem:[#allocation5 + $0xa0] sm:$0xff] %vm667_vm4, %v1525_v13 }
 0x39b   : > { %v1521_v14 = vpop.permute.xlu1 %1520 }
 0x39c   : > { %v1565_v15 = vpop.permute.xlu0 %1564 }
 0x39d   : > { %1584 = vst.msk [vmem:[#allocation5 + $0xd0] sm:$0xff] %vm667_vm4, %v1565_v15 }
 0x39f   : > { %v1561_v16 = vpop.permute.xlu1 %1560 }
 0x3a0   : > { %v1447_v17 = vpop.permute.xlu0 %1446 }
 0x3a3   : > { %v1443_v18 = vpop.permute.xlu1 %1442 }
 0x3a4   : > { %v1452_v19 = vsel %vm696_vm5, %v1441_v10, %v1443_v18  ;;  %v1453_v20 = vsel %vm696_vm5, %v1443_v18, %v1445_v9  ;;  %v1487_v21 = vpop.permute.xlu0 %1486  ;;  %v1782_v22 = vld [vmem:[#allocation5 + $0xd0] sm:$0xff] }
 0x3a5   : > { %2251 = vmatprep.subr.bf16.mxu0 %v1782_v22  ;;  %1874 = vmatprep.subr.bf16.mxu1 %v1453_v20  ;;  %v1770_v22 = vld [vmem:[#allocation5 + $0x70] sm:$0xff] }
 0x3a6   : > { %2252 = vmatpush3.bf16.msra.mxu0 %v1758_v23  ;;  %1875 = vmatpush1.bf16.msra.mxu1 %v1452_v19 }
 0x3a7   : > { %v1483_v24 = vpop.permute.xlu1 %1482 }
 0x3a8   : > { %v1492_v25 = vsel %vm737_vm6, %v1481_v12, %v1483_v24  ;;  %v1493_v26 = vsel %vm737_vm6, %v1483_v24, %v1485_v11  ;;  %v1527_v27 = vpop.permute.xlu0 %1526  ;;  %v1764_v11 = vld [vmem:[#allocation5 + $0x40] sm:$0xff] }
 0x3ab   : > { %v1523_v28 = vpop.permute.xlu1 %1522 }
 0x3ac   : > { %v1532_v29 = vsel %vm778_vm7, %v1521_v14, %v1523_v28  ;;  %v1533_v30 = vsel %vm778_vm7, %v1523_v28, %v1525_v13  ;;  %v1449_v31 = vpop.permute.xlu0 %1448 }
 0x3ad   : > { %v1454_v32 = vsel %vm696_vm5, %v1447_v17, %v1449_v31 }
 0x3af   : > { %v1563_v33 = vpop.permute.xlu1 %1562 }
 0x3b0   : > { %v1572_v34 = vsel %vm819_vm8, %v1561_v16, %v1563_v33  ;;  %v1573_v35 = vsel %vm819_vm8, %v1563_v33, %v1565_v15  ;;  %v1567_v36 = vpop.permute.xlu0 %1566 }
 0x3b3   : > { %v1451_v37 = vpop.permute.xlu1 %1450 }
 0x3b4   : > { %v1455_v38 = vsel %vm696_vm5, %v1449_v31, %v1451_v37  ;;  %1467 = vst.msk [vmem:[#allocation5 + $0x58] sm:$0xff] %vm667_vm4, %v1451_v37  ;;  %v1489_v39 = vpop.permute.xlu0 %1488  ;;  %v2409_v31 = vld [vmem:[%s2943_s6 + $0x1c] ss:$12 sps:$4 sm:$0xff]  }
 0x3b5   : > { %v1494_v40 = vsel %vm737_vm6, %v1487_v21, %v1489_v39  ;;  %1876 = vmatprep.subr.bf16.mxu1 %v1455_v38 }
 0x3b6   : > { %1877 = vmatpush1.bf16.msra.mxu1 %v1454_v32 }
 0x3b7   : > { %v1603_v41 = vpop.permute.xlu1 %1602  ;;  %1878 = vmatprep.subr.bf16.mxu1 %v1493_v26 }
 0x3b8   : > { %v1605_v42 = vpop.permute.xlu0 %1604 }
 0x3b9   : > { %v1613_v43 = vsel %vm860_vm9, %v1603_v41, %v1605_v42  ;;  %1624 = vst.msk [vmem:[#allocation5 + $0x100] sm:$0xff] %vm667_vm4, %v1605_v42 }
 0x3ba   : > { %1879 = vmatpush1.bf16.msra.mxu1 %v1492_v25 }
 0x3bb   : > { %v1491_v44 = vpop.permute.xlu1 %1490  ;;  %v1767_v17 = vld [vmem:[#allocation5 + $0x58] sm:$0xff] }
 0x3bc   : > { %v1495_v45 = vsel %vm737_vm6, %v1489_v39, %v1491_v44  ;;  %1507 = vst.msk [vmem:[#allocation5 + $0x88] sm:$0xff] %vm667_vm4, %v1491_v44  ;;  %v1529_v46 = vpop.permute.xlu0 %1528 }
 0x3bd   : > { %v1534_v47 = vsel %vm778_vm7, %v1527_v27, %v1529_v46  ;;  %1880 = vmatprep.subr.bf16.mxu1 %v1495_v45 }
 0x3be   : > { %1881 = vmatpush1.bf16.msra.mxu1 %v1494_v40 }
 0x3bf   : > { %v1601_v48 = vpop.permute.xlu1 %1600  ;;  %1882 = vmatprep.subr.bf16.mxu1 %v1533_v30  ;;  %v2406_v30 = vld [vmem:[%s2943_s6] ss:$12 sps:$4 sm:$0xff]  }
 0x3c0   : > { %v1612_v49 = vsel %vm860_vm9, %v1601_v48, %v1603_v41  ;;  %v1607_v50 = vpop.permute.xlu0 %1606  ;;  %v1788_v8 = vld [vmem:[#allocation5 + $0x100] sm:$0xff]  ;;  %v2413_v48 = vld [vmem:[%s2943_s6 + $0x20] ss:$12 sps:$4 sm:$0xff]  }
 0x3c2   : > { %1883 = vmatpush1.bf16.msra.mxu1 %v1532_v29 }
 0x3c3   : > { %v1531_v51 = vpop.permute.xlu1 %1530  ;;  %v1773_v28 = vld [vmem:[#allocation5 + $0x88] sm:$0xff] }
 0x3c4   : > { %v1535_v52 = vsel %vm778_vm7, %v1529_v46, %v1531_v51  ;;  %1547 = vst.msk [vmem:[#allocation5 + $0xb8] sm:$0xff] %vm667_vm4, %v1531_v51  ;;  %v1569_v53 = vpop.permute.xlu0 %1568  ;;  %v2412_v46 = vld [vmem:[%s2943_s6 + $0x8] ss:$12 sps:$4 sm:$0xff]  }
 0x3c5   : > { %v1574_v54 = vsel %vm819_vm8, %v1567_v36, %v1569_v53  ;;  %1884 = vmatprep.subr.bf16.mxu1 %v1535_v52 }
 0x3c6   : > { %1885 = vmatpush1.bf16.msra.mxu1 %v1534_v47 }
 0x3c7   : > { %v1643_v55 = vpop.permute.xlu1 %1642  ;;  %1886 = vmatprep.subr.bf16.mxu1 %v1573_v35  ;;  %v1776_v35 = vld [vmem:[#allocation5 + $0xa0] sm:$0xff] }
 0x3c8   : > { %v1645_v56 = vpop.permute.xlu0 %1644 }
 0x3c9   : > { %v1653_v57 = vsel %vm901_vm10, %v1643_v55, %v1645_v56  ;;  %1664 = vst.msk [vmem:[#allocation5 + $0x130] sm:$0xff] %vm667_vm4, %v1645_v56 }
 0x3ca   : > { %1887 = vmatpush1.bf16.msra.mxu1 %v1572_v34 }
 0x3cb   : > { %v1571_v58 = vpop.permute.xlu1 %1570  ;;  %v1779_v40 = vld [vmem:[#allocation5 + $0xb8] sm:$0xff] }
 0x3cc   : > { %v1575_v59 = vsel %vm819_vm8, %v1569_v53, %v1571_v58  ;;  %1587 = vst.msk [vmem:[#allocation5 + $0xe8] sm:$0xff] %vm667_vm4, %v1571_v58  ;;  %v1609_v60 = vpop.permute.xlu0 %1608 }
 0x3cd   : > { %v1614_v61 = vsel %vm860_vm9, %v1607_v50, %v1609_v60  ;;  %1888 = vmatprep.subr.bf16.mxu1 %v1575_v59 }
 0x3ce   : > { %1889 = vmatpush1.bf16.msra.mxu1 %v1574_v54 }
 0x3cf   : > { %v1641_v62 = vpop.permute.xlu1 %1640  ;;  %1890 = vmatprep.subr.bf16.mxu1 %v1613_v43  ;;  %v2411_v43 = vld [vmem:[%s2943_s6 + $0x18] ss:$12 sps:$4 sm:$0xff]  }
 0x3d0   : > { %v1652_v63 = vsel %vm901_vm10, %v1641_v62, %v1643_v55  ;;  %v1647_v0 = vpop.permute.xlu0 %1646  ;;  %v1794_v18 = vld [vmem:[#allocation5 + $0x130] sm:$0xff] }
 0x3d2   : > { %1891 = vmatpush1.bf16.msra.mxu1 %v1612_v49 }
 0x3d3   : > { %v1611_v1 = vpop.permute.xlu1 %1610  ;;  %v1785_v2 = vld [vmem:[#allocation5 + $0xe8] sm:$0xff] }
 0x3d4   : > { %v1615_v3 = vsel %vm860_vm9, %v1609_v60, %v1611_v1  ;;  %1627 = vst.msk [vmem:[#allocation5 + $0x118] sm:$0xff] %vm667_vm4, %v1611_v1  ;;  %2253 = vmatprep.subr.bf16.mxu0 %v1785_v2  ;;  %v1649_v4 = vpop.permute.xlu0 %1648 }
 0x3d5   : > { %v1654_v7 = vsel %vm901_vm10, %v1647_v0, %v1649_v4  ;;  %2254 = vmatpush3.bf16.msra.mxu0 %v1761_v6  ;;  %1892 = vmatprep.subr.bf16.mxu1 %v1615_v3 }
 0x3d6   : > { %2255 = vmatprep.subr.bf16.mxu0 %v1788_v8  ;;  %1893 = vmatpush1.bf16.msra.mxu1 %v1614_v61 }
 0x3d7   : > { %v1683_v9 = vpop.permute.xlu1 %1682  ;;  %1894 = vmatprep.subr.bf16.mxu1 %v1653_v57 }
 0x3d8   : > { %v1685_v10 = vpop.permute.xlu0 %1684 }
 0x3d9   : > { %v1693_v12 = vsel %vm942_vm11, %v1683_v9, %v1685_v10  ;;  %1704 = vst.msk [vmem:[#allocation5 + $0x160] sm:$0xff] %vm667_vm4, %v1685_v10  ;;  %2256 = vmatpush3.bf16.msra.mxu0 %v1764_v11 }
 0x3da   : > { %1895 = vmatpush1.bf16.msra.mxu1 %v1652_v63 }
 0x3db   : > { %v1651_v13 = vpop.permute.xlu1 %1650  ;;  %v1791_v14 = vld [vmem:[#allocation5 + $0x118] sm:$0xff] }
 0x3dc   : > { %v1655_v15 = vsel %vm901_vm10, %v1649_v4, %v1651_v13  ;;  %1667 = vst.msk [vmem:[#allocation5 + $0x148] sm:$0xff] %vm667_vm4, %v1651_v13  ;;  %2257 = vmatprep.subr.bf16.mxu0 %v1791_v14  ;;  %v1689_v16 = vpop.permute.xlu0 %1688 }
 0x3dd   : > { %2258 = vmatpush3.bf16.msra.mxu0 %v1767_v17  ;;  %1896 = vmatprep.subr.bf16.mxu1 %v1655_v15 }
 0x3de   : > { %2259 = vmatprep.subr.bf16.mxu0 %v1794_v18  ;;  %1897 = vmatpush1.bf16.msra.mxu1 %v1654_v7 }
 0x3df   : > { %v1681_v19 = vpop.permute.xlu1 %1680  ;;  %1898 = vmatprep.subr.bf16.mxu1 %v1693_v12 }
 0x3e0   : > { %v1692_v20 = vsel %vm942_vm11, %v1681_v19, %v1683_v9  ;;  %v1687_v21 = vpop.permute.xlu0 %1686  ;;  %v1800_v29 = vld [vmem:[#allocation5 + $0x160] sm:$0xff] }
 0x3e1   : > { %v1694_v23 = vsel %vm942_vm11, %v1687_v21, %v1689_v16  ;;  %2260 = vmatpush3.bf16.msra.mxu0 %v1770_v22 }
 0x3e2   : > { %1899 = vmatpush1.bf16.msra.mxu1 %v1692_v20 }
 0x3e3   : > { %v1691_v24 = vpop.permute.xlu1 %1690  ;;  %v1797_v25 = vld [vmem:[#allocation5 + $0x148] sm:$0xff] }
 0x3e4   : > { %v1695_v26 = vsel %vm942_vm11, %v1689_v16, %v1691_v24  ;;  %1707 = vst.msk [vmem:[#allocation5 + $0x178] sm:$0xff] %vm667_vm4, %v1691_v24  ;;  %2261 = vmatprep.subr.bf16.mxu0 %v1797_v25  ;;  %v1725_v27 = vpop.permute.xlu0 %1724 }
 0x3e5   : > { %1744 = vst.msk [vmem:[#allocation5 + $0x190] sm:$0xff] %vm667_vm4, %v1725_v27  ;;  %2262 = vmatpush3.bf16.msra.mxu0 %v1773_v28  ;;  %1900 = vmatprep.subr.bf16.mxu1 %v1695_v26 }
 0x3e6   : > { %2263 = vmatprep.subr.bf16.mxu0 %v1800_v29  ;;  %1901 = vmatpush1.bf16.msra.mxu1 %v1694_v23 }
 0x3e7   : > { %v1723_v32 = vpop.permute.xlu1 %1722 }
 0x3e8   : > { %v1733_v33 = vsel %vm983_vm12, %v1723_v32, %v1725_v27  ;;  %v1729_v34 = vpop.permute.xlu0 %1728 }
 0x3e9   : > { %2264 = vmatpush3.bf16.msra.mxu0 %v1776_v35  ;;  %1903 = vmatmul.mubr.bf16.vlgmr.msra.gmra.mrb[16].mxu1 %v2406_v30 }
 0x3ea   : > { %1923 = vmatprep.subr.bf16.mxu1 %v1733_v33  ;;  %1912 = vmatprep.mubr.bf16.mxu1 %v2409_v31 }
 0x3eb   : > { %v1721_v36 = vpop.permute.xlu1 %1720  ;;  %v1803_v37 = vld [vmem:[#allocation5 + $0x178] sm:$0xff] }
 0x3ec   : > { %v1732_v38 = vsel %vm983_vm12, %v1721_v36, %v1723_v32  ;;  %2265 = vmatprep.subr.bf16.mxu0 %v1803_v37  ;;  %v1727_v39 = vpop.permute.xlu0 %1726  ;;  %v1806_v41 = vld [vmem:[#allocation5 + $0x190] sm:$0xff] }
 0x3ed   : > { %v1734_v42 = vsel %vm983_vm12, %v1727_v39, %v1729_v34  ;;  %2266 = vmatpush3.bf16.msra.mxu0 %v1779_v40  ;;  %1924 = vmatpush1.bf16.msra.mxu1 %v1732_v38 }
 0x3ee   : > { %2303 = vmatprep.subr.bf16.mxu0 %v1806_v41 }
 0x3ef   : > { %v1731_v44 = vpop.permute.xlu1 %1730 }
 0x3f0   : > { %v1735_v45 = vsel %vm983_vm12, %v1729_v34, %v1731_v44  ;;  %1747 = vst.msk [vmem:[#allocation5 + $0x1a8] sm:$0xff] %vm667_vm4, %v1731_v44  ;;  %2009 = vmatmul.mubr.bf16.vlgmr.msra.gmra.mrb[12].mxu0 %v2406_v30 }
 0x3f1   : > { %2304 = vmatpush3.bf16.msra.mxu0 %v1806_v41  ;;  %2016 = vmatprep.mubr.bf16.mxu0 %v2409_v31 }
 0x3f2   : > { %1913 = vmatmul.mubr.bf16.gmra.mrb[20].mxu1 %v2411_v43  ;;  %1925 = vmatprep.subr.bf16.mxu1 %v1735_v45 }
 0x3f3   : > { %1926 = vmatpush1.bf16.msra.mxu1 %v1734_v42  ;;  %1955 = vmatprep.mubr.bf16.mxu1 %v2424_v5 }
 0x3f7   : > { %v1809_v47 = vld [vmem:[#allocation5 + $0x1a8] sm:$0xff] }
 0x3f8   : > { %2017 = vmatmul.mubr.bf16.gmra.mrb[16].mxu0 %v2411_v43  ;;  %2305 = vmatprep.subr.bf16.mxu0 %v1809_v47 }
 0x3f9   : > { %2306 = vmatpush3.bf16.msra.mxu0 %v1809_v47  ;;  %2307 = vmatprep.mubr.msk.bf16.mxu0 %vm667_vm4, %v2412_v46 }
 0x3fa   : > { %2206 = vmatmul.mubr.msk.bf16.vlgmr.msra.gmra.mrb[16].mxu1 %vm667_vm4, %v2412_v46 }
 0x3fb   : > { %1965 = vmatprep.mubr.bf16.mxu1 %v2424_v5 }
 0x3fd   : > { %v1822_v57 = vpop.permute.xlu0 %1821 }
 0x400   : > { %2308 = vmatmul.mubr.msk.bf16.vlgmr.msra.gmra.mrb[20].mxu0 %vm667_vm4, %v2413_v48  ;;  %v1817_v55 = vpop.permute.xlu1 %1816 }
 0x401   : > { %v1832_v12 = vpop.permute.xlu0 %1831 }
 0x402   : > { %2207 = vmatmul.mubr.msk.bf16.gmra.mrb[20].mxu1 %vm667_vm4, %v2413_v48 }
 0x404   : > { %v1827_v7 = vpop.permute.xlu1 %1826 }
 0x4c3   : > { %v2267_v49 = vpop.f32.mrb[12].mxu0 }
 0x4c4   : > { %v2268_v50 = vpop.f32.mrb[13].mxu0 }
 0x4c5   : > { %v2269_v51 = vadd.f32 %v2268_v50, %v2267_v49  ;;  %v2270_v52 = vpop.f32.mrb[14].mxu0 }
 0x4c6   : > { %v2271_v53 = vpop.f32.mrb[15].mxu0 }
 0x4c7   : > { %v2272_v54 = vadd.f32 %v2271_v53, %v2270_v52  ;;  %v2011_v14 = vadd.f32 %v2269_v51, %v1817_v55 }
 0x4c9   : > { %v2014_v21 = vadd.f32 %v2272_v54, %v1822_v57 }
 0x4cb   : > { %v2273_v56 = vpop.f32.mrb[16].mxu0 }
 0x4cc   : > { %v2274_v58 = vpop.f32.mrb[17].mxu0 }
 0x4cd   : > { %v2275_v5 = vadd.f32 %v2274_v58, %v2273_v56  ;;  %v2276_v59 = vpop.f32.mrb[18].mxu0  ;;  %v1957_v60 = vpop.f32.mrb[16].mxu1 }
 0x4ce   : > { %v2277_v61 = vpop.f32.mrb[19].mxu0  ;;  %v2319_v62 = vadd.f32 %v1957_v60, %v1817_v55  ;;  %v1959_v63 = vpop.f32.mrb[17].mxu1 }
 0x4cf   : > { %v2278_v0 = vadd.f32 %v2277_v61, %v2276_v59  ;;  %v2320_v1 = vadd.f32 %v1959_v63, %v1817_v55  ;;  %v1961_v2 = vpop.f32.mrb[18].mxu1  ;;  %v2019_v10 = vadd.f32 %v2275_v5, %v1827_v7 }
 0x4d0   : > { %v2074_v3 = vmax.f32 %v2319_v62, 0.0  ;;  %v2321_v4 = vadd.f32 %v1961_v2, %v1822_v57  ;;  %v1963_v6 = vpop.f32.mrb[19].mxu1 }
 0x4d1   : > { %v2075_v8 = vmax.f32 %v2320_v1, 0.0  ;;  %v2322_v9 = vadd.f32 %v1963_v6, %v1822_v57  ;;  %v2022_v18 = vadd.f32 %v2278_v0, %v1832_v12 }
 0x4d2   : > { %2086 = vst [vmem:[%s2916_s18] sm:$0xff] %v2074_v3  ;;  %v2077_v11 = vmax.f32 %v2321_v4, 0.0 }
 0x4d3   : > { %v2309_v13 = vpop.f32.mrb[20].mxu0  ;;  %2087 = vst [vmem:[%s2916_s18 + $0x8] sm:$0xff] %v2075_v8  ;;  %v2078_v15 = vmax.f32 %v2322_v9, 0.0 }
 0x4d4   : > { %v2068_v16 = vadd.f32 %v2309_v13, %v2019_v10  ;;  %v2059_v17 = vpop.f32.mrb[21].mxu0  ;;  %2089 = vst [vmem:[%s2916_s18 + $0x18] sm:$0xff] %v2077_v11 }
 0x4d5   : > { %v2060_v19 = vadd.f32 %v2059_v17, %v2011_v14  ;;  %v2310_v20 = vpop.f32.mrb[22].mxu0  ;;  %2090 = vst [vmem:[%s2916_s18 + $0x20] sm:$0xff] %v2078_v15  ;;  %v1967_v22 = vpop.f32.mrb[20].mxu1 }
 0x4d6   : > { %v2082_v23 = vmax.f32 %v2068_v16, 0.0  ;;  %v2071_v24 = vadd.f32 %v2310_v20, %v2022_v18  ;;  %v2062_v25 = vpop.f32.mrb[23].mxu0  ;;  %v2323_v26 = vadd.f32 %v1967_v22, %v1827_v7  ;;  %v1969_v27 = vpop.f32.mrb[21].mxu1 }
 0x4d7   : > { %v2076_v28 = vmax.f32 %v2060_v19, 0.0  ;;  %v2063_v29 = vadd.f32 %v2062_v25, %v2014_v21  ;;  %v2324_v30 = vadd.f32 %v1969_v27, %v1827_v7  ;;  %v1971_v31 = vpop.f32.mrb[22].mxu1 }
 0x4d8   : > { %2094 = vst.msk [vmem:[%s2916_s18 + $0x40] sm:$0xff] %vm667_vm4, %v2082_v23  ;;  %v2085_v32 = vmax.f32 %v2071_v24, 0.0  ;;  %v2080_v33 = vmax.f32 %v2323_v26, 0.0  ;;  %v2325_v34 = vadd.f32 %v1971_v31, %v1832_v12  ;;  %v1973_v35 = vpop.f32.mrb[23].mxu1 }
 0x4d9   : > { %2088 = vst.msk [vmem:[%s2916_s18 + $0x10] sm:$0xff] %vm667_vm4, %v2076_v28  ;;  %v2079_v36 = vmax.f32 %v2063_v29, 0.0  ;;  %v2081_v37 = vmax.f32 %v2324_v30, 0.0  ;;  %v2326_v38 = vadd.f32 %v1973_v35, %v1832_v12 }
 0x4da   : > { %2097 = vst.msk [vmem:[%s2916_s18 + $0x58] sm:$0xff] %vm667_vm4, %v2085_v32  ;;  %2092 = vst [vmem:[%s2916_s18 + $0x30] sm:$0xff] %v2080_v33  ;;  %v2083_v39 = vmax.f32 %v2325_v34, 0.0 }
 0x4db   : > { %2091 = vst.msk [vmem:[%s2916_s18 + $0x28] sm:$0xff] %vm667_vm4, %v2079_v36  ;;  %2093 = vst [vmem:[%s2916_s18 + $0x38] sm:$0xff] %v2081_v37  ;;  %v2084_v40 = vmax.f32 %v2326_v38, 0.0 }
 0x4dc   : > { %2095 = vst [vmem:[%s2916_s18 + $0x48] sm:$0xff] %v2083_v39 }
 0x4dd   : > { %2096 = vst [vmem:[%s2916_s18 + $0x50] sm:$0xff] %v2084_v40 }
 0x4de PF: > { %s18_s27 = sadd.s32 1, %s2420_s27  }
 0x4df   : > { %p15_p4 = scmp.ge.s32.totalorder %s18_s27, 4  }
 0x4e1   :  { %17 = sbr.rel (!%p15_p4) target bundleno = 1 (0x1), region = 85 }

</bundles_post_ra>
